<compile_context>
chip_gen: v7x
topology: tpu7x:2x2x1
jax: 0.10.0
libtpu: 0.0.40
codegen_flags: <defaults>
</compile_context>

<pallas_src>
import jax
import jax.numpy as jnp
import numpy as np
from jax.experimental import pallas as pl
from jax.experimental.pallas import tpu as pltpu

HIDDEN = 256


def _round_up(x, m):
    return ((x + m - 1) // m) * m


def _mlp_kernel(x_ref,
                w1_ref, b1_ref,
                w2_ref, b2_ref,
                w3_ref, b3_ref,
                w4_ref, b4_ref,
                o_ref):
    # Hoist bias loads (each is a (1, N) f32 row broadcast once).
    b1 = b1_ref[...]
    b2 = b2_ref[...]
    b3 = b3_ref[...]
    b4 = b4_ref[...]

    x = x_ref[...]  # (block_batch, obs_pad) in compute dtype (bf16 by default)

    # All four matmuls hit the MXU with f32 accumulation; ReLU on the VPU.
    h = jnp.dot(x, w1_ref[...], preferred_element_type=jnp.float32) + b1
    h = jnp.maximum(h, 0.0).astype(w2_ref.dtype)

    h = jnp.dot(h, w2_ref[...], preferred_element_type=jnp.float32) + b2
    h = jnp.maximum(h, 0.0).astype(w3_ref.dtype)

    h = jnp.dot(h, w3_ref[...], preferred_element_type=jnp.float32) + b3
    h = jnp.maximum(h, 0.0).astype(w4_ref.dtype)

    q = jnp.dot(h, w4_ref[...], preferred_element_type=jnp.float32) + b4
    o_ref[...] = q.astype(o_ref.dtype)


def fully_connected_q_forward(observations, params, *, block_batch=128,
                              compute_dtype=jnp.bfloat16):
    """observations: [B, obs_dim] float32 -> [B, action_dim] float32."""
    w1, b1, w2, b2, w3, b3, w4, b4 = params
    B, obs_dim = observations.shape
    action_dim = w4.shape[1]
    assert block_batch % 8 == 0, "block_batch must be a multiple of 8 (sublanes)"

    # Pad everything to hardware-friendly shapes:
    #   batch     -> multiple of block_batch (ragged batches supported)
    #   obs dim   -> multiple of 128 lanes (zero feature columns, zero w1 rows)
    #   action dim-> multiple of 128 lanes (lane-dense unmasked output stores)
    b_pad = _round_up(B, block_batch)
    obs_pad = _round_up(obs_dim, 128)
    act_pad = _round_up(action_dim, 128)

    x = observations.astype(compute_dtype)
    x = jnp.pad(x, ((0, b_pad - B), (0, obs_pad - obs_dim)))

    w1p = jnp.pad(w1, ((0, obs_pad - obs_dim), (0, 0))).astype(compute_dtype)
    w2p = w2.astype(compute_dtype)
    w3p = w3.astype(compute_dtype)
    w4p = jnp.pad(w4, ((0, 0), (0, act_pad - action_dim))).astype(compute_dtype)
    b4p = jnp.pad(b4, ((0, 0), (0, act_pad - action_dim)))  # biases stay f32

    grid = (b_pad // block_batch,)

    # Weights / biases are small (< 1 MiB total) and use a constant index_map,
    # so they stay resident in VMEM; only x / out tiles move per grid step.
    def full(arr):
        return pl.BlockSpec(arr.shape, lambda i: (0,) * arr.ndim)

    out = pl.pallas_call(
        _mlp_kernel,
        out_shape=jax.ShapeDtypeStruct((b_pad, act_pad), jnp.float32),
        grid_spec=pltpu.PrefetchScalarGridSpec(
            num_scalar_prefetch=0,
            grid=grid,
            in_specs=[
                pl.BlockSpec((block_batch, obs_pad), lambda i: (i, 0)),
                full(w1p), full(b1),
                full(w2p), full(b2),
                full(w3p), full(b3),
                full(w4p), full(b4p),
            ],
            out_specs=pl.BlockSpec((block_batch, act_pad), lambda i: (i, 0)),
        ),
        compiler_params=pltpu.CompilerParams(
            dimension_semantics=("parallel",)),
    )(x, w1p, b1, w2p, b2, w3p, b3, w4p, b4p)

    return out[:B, :action_dim]


def init_params(key, observation_dim, action_dim, n_hidden_layers=3):
    """Deterministic init mimicking the PyTorch module (orthogonal_init=False):
    hidden Linear layers use PyTorch-default uniform(-1/sqrt(fan_in), 1/sqrt(fan_in));
    final layer uses xavier_uniform with gain=0.01 and zero bias."""
    dims = [observation_dim] + [HIDDEN] * n_hidden_layers + [action_dim]
    params = []
    for li in range(len(dims) - 1):
        fan_in, fan_out = dims[li], dims[li + 1]
        key, kw, kb = jax.random.split(key, 3)
        if li < len(dims) - 2:
            bound = 1.0 / np.sqrt(fan_in)
            w = jax.random.uniform(kw, (fan_in, fan_out), jnp.float32, -bound, bound)
            b = jax.random.uniform(kb, (1, fan_out), jnp.float32, -bound, bound)
        else:
            # xavier_uniform, gain=0.01
            bound = 0.01 * np.sqrt(6.0 / (fan_in + fan_out))
            w = jax.random.uniform(kw, (fan_in, fan_out), jnp.float32, -bound, bound)
            b = jnp.zeros((1, fan_out), jnp.float32)
        params += [w, b]
    return tuple(params)


def _ref_forward(observations, params, compute_dtype=jnp.bfloat16):
    """Pure-JAX reference with the same bf16-operand / f32-accumulate recipe."""
    w1, b1, w2, b2, w3, b3, w4, b4 = params
    cd = compute_dtype
    x = observations.astype(cd)
    h = jnp.maximum(jnp.dot(x, w1.astype(cd), preferred_element_type=jnp.float32) + b1, 0.0)
    h = jnp.maximum(jnp.dot(h.astype(cd), w2.astype(cd), preferred_element_type=jnp.float32) + b2, 0.0)
    h = jnp.maximum(jnp.dot(h.astype(cd), w3.astype(cd), preferred_element_type=jnp.float32) + b3, 0.0)
    return jnp.dot(h.astype(cd), w4.astype(cd), preferred_element_type=jnp.float32) + b4


if __name__ == "__main__":
    key = jax.random.PRNGKey(0)
    # Deliberately "ragged" shapes to exercise the padding paths:
    # batch not a multiple of 128, obs/action dims not multiples of 128.
    batch, obs_dim, action_dim = 200, 17, 6

    key, k_obs, k_params = jax.random.split(key, 3)
    observations = jax.random.normal(k_obs, (batch, obs_dim), jnp.float32)
    params = init_params(k_params, obs_dim, action_dim, n_hidden_layers=3)

    q = fully_connected_q_forward(observations, params)
    q = jax.block_until_ready(q)
    assert q.shape == (batch, action_dim)

    # Matched-precision reference (bf16 MXU operands, f32 accumulation).
    ref = jax.block_until_ready(_ref_forward(observations, params))
    np.testing.assert_allclose(np.asarray(q), np.asarray(ref), rtol=5e-3, atol=1e-4)

    print("KERNEL_OK")
</pallas_src>

<mosaic_0001>
module attributes {stable_mosaic.version = 11 : i64} {
  func.func @_mlp_kernel(%arg0: i32, %arg1: memref<128x128xbf16, #tpu.memory_space<vmem>>, %arg2: memref<128x256xbf16, #tpu.memory_space<vmem>>, %arg3: memref<1x256xf32, #tpu.memory_space<vmem>>, %arg4: memref<256x256xbf16, #tpu.memory_space<vmem>>, %arg5: memref<1x256xf32, #tpu.memory_space<vmem>>, %arg6: memref<256x256xbf16, #tpu.memory_space<vmem>>, %arg7: memref<1x256xf32, #tpu.memory_space<vmem>>, %arg8: memref<256x128xbf16, #tpu.memory_space<vmem>>, %arg9: memref<1x128xf32, #tpu.memory_space<vmem>>, %arg10: memref<128x128xf32, #tpu.memory_space<vmem>>) attributes {dimension_semantics = [#tpu.dimension_semantics<parallel>], iteration_bounds = array<i64: 2>, scalar_prefetch = 0 : i64, scratch_operands = 0 : i64, tpu.core_type = #tpu.core_type<tc>, window_params = [{transform_indices = @transform_0, window_bounds = array<i64: 128, 128>}, {pipeline_mode = #tpu.pipeline_mode<synchronous>, transform_indices = @transform_1, window_bounds = array<i64: 128, 256>}, {pipeline_mode = #tpu.pipeline_mode<synchronous>, transform_indices = @transform_2, window_bounds = array<i64: 1, 256>}, {pipeline_mode = #tpu.pipeline_mode<synchronous>, transform_indices = @transform_3, window_bounds = array<i64: 256, 256>}, {pipeline_mode = #tpu.pipeline_mode<synchronous>, transform_indices = @transform_4, window_bounds = array<i64: 1, 256>}, {pipeline_mode = #tpu.pipeline_mode<synchronous>, transform_indices = @transform_5, window_bounds = array<i64: 256, 256>}, {pipeline_mode = #tpu.pipeline_mode<synchronous>, transform_indices = @transform_6, window_bounds = array<i64: 1, 256>}, {pipeline_mode = #tpu.pipeline_mode<synchronous>, transform_indices = @transform_7, window_bounds = array<i64: 256, 128>}, {pipeline_mode = #tpu.pipeline_mode<synchronous>, transform_indices = @transform_8, window_bounds = array<i64: 1, 128>}, {transform_indices = @transform_9, window_bounds = array<i64: 128, 128>}]} {
    %c0 = arith.constant 0 : index
    %c0_0 = arith.constant 0 : index
    %0 = vector.load %arg3[%c0, %c0_0] : memref<1x256xf32, #tpu.memory_space<vmem>>, vector<1x256xf32>
    %c0_1 = arith.constant 0 : index
    %c0_2 = arith.constant 0 : index
    %1 = vector.load %arg5[%c0_1, %c0_2] : memref<1x256xf32, #tpu.memory_space<vmem>>, vector<1x256xf32>
    %c0_3 = arith.constant 0 : index
    %c0_4 = arith.constant 0 : index
    %2 = vector.load %arg7[%c0_3, %c0_4] : memref<1x256xf32, #tpu.memory_space<vmem>>, vector<1x256xf32>
    %c0_5 = arith.constant 0 : index
    %c0_6 = arith.constant 0 : index
    %3 = vector.load %arg9[%c0_5, %c0_6] : memref<1x128xf32, #tpu.memory_space<vmem>>, vector<1x128xf32>
    %c0_7 = arith.constant 0 : index
    %c0_8 = arith.constant 0 : index
    %4 = vector.load %arg1[%c0_7, %c0_8] : memref<128x128xbf16, #tpu.memory_space<vmem>>, vector<128x128xbf16>
    %c0_9 = arith.constant 0 : index
    %c0_10 = arith.constant 0 : index
    %5 = vector.load %arg2[%c0_9, %c0_10] : memref<128x256xbf16, #tpu.memory_space<vmem>>, vector<128x256xbf16>
    %cst = arith.constant dense<0.000000e+00> : vector<128x256xf32>
    %6 = tpu.matmul %4, %5, %cst {dimension_numbers = #tpu.dot_dimension_numbers<[1], [0], [0], [1], [0, 0, 1, 1], [], []>} : vector<128x128xbf16>, vector<128x256xbf16>, vector<128x256xf32> -> vector<128x256xf32>
    %7 = vector.broadcast %0 : vector<1x256xf32> to vector<128x256xf32>
    %8 = arith.addf %6, %7 : vector<128x256xf32>
    %cst_11 = arith.constant 0.000000e+00 : f32
    %9 = vector.broadcast %cst_11 : f32 to vector<128x256xf32>
    %10 = arith.maximumf %8, %9 : vector<128x256xf32>
    %11 = arith.truncf %10 : vector<128x256xf32> to vector<128x256xbf16>
    %c0_12 = arith.constant 0 : index
    %c0_13 = arith.constant 0 : index
    %12 = vector.load %arg4[%c0_12, %c0_13] : memref<256x256xbf16, #tpu.memory_space<vmem>>, vector<256x256xbf16>
    %cst_14 = arith.constant dense<0.000000e+00> : vector<128x256xf32>
    %13 = tpu.matmul %11, %12, %cst_14 {dimension_numbers = #tpu.dot_dimension_numbers<[1], [0], [0], [1], [0, 0, 1, 1], [], []>} : vector<128x256xbf16>, vector<256x256xbf16>, vector<128x256xf32> -> vector<128x256xf32>
    %14 = vector.broadcast %1 : vector<1x256xf32> to vector<128x256xf32>
    %15 = arith.addf %13, %14 : vector<128x256xf32>
    %cst_15 = arith.constant 0.000000e+00 : f32
    %16 = vector.broadcast %cst_15 : f32 to vector<128x256xf32>
    %17 = arith.maximumf %15, %16 : vector<128x256xf32>
    %18 = arith.truncf %17 : vector<128x256xf32> to vector<128x256xbf16>
    %c0_16 = arith.constant 0 : index
    %c0_17 = arith.constant 0 : index
    %19 = vector.load %arg6[%c0_16, %c0_17] : memref<256x256xbf16, #tpu.memory_space<vmem>>, vector<256x256xbf16>
    %cst_18 = arith.constant dense<0.000000e+00> : vector<128x256xf32>
    %20 = tpu.matmul %18, %19, %cst_18 {dimension_numbers = #tpu.dot_dimension_numbers<[1], [0], [0], [1], [0, 0, 1, 1], [], []>} : vector<128x256xbf16>, vector<256x256xbf16>, vector<128x256xf32> -> vector<128x256xf32>
    %21 = vector.broadcast %2 : vector<1x256xf32> to vector<128x256xf32>
    %22 = arith.addf %20, %21 : vector<128x256xf32>
    %cst_19 = arith.constant 0.000000e+00 : f32
    %23 = vector.broadcast %cst_19 : f32 to vector<128x256xf32>
    %24 = arith.maximumf %22, %23 : vector<128x256xf32>
    %25 = arith.truncf %24 : vector<128x256xf32> to vector<128x256xbf16>
    %c0_20 = arith.constant 0 : index
    %c0_21 = arith.constant 0 : index
    %26 = vector.load %arg8[%c0_20, %c0_21] : memref<256x128xbf16, #tpu.memory_space<vmem>>, vector<256x128xbf16>
    %cst_22 = arith.constant dense<0.000000e+00> : vector<128x128xf32>
    %27 = tpu.matmul %25, %26, %cst_22 {dimension_numbers = #tpu.dot_dimension_numbers<[1], [0], [0], [1], [0, 0, 1, 1], [], []>} : vector<128x256xbf16>, vector<256x128xbf16>, vector<128x128xf32> -> vector<128x128xf32>
    %28 = vector.broadcast %3 : vector<1x128xf32> to vector<128x128xf32>
    %29 = arith.addf %27, %28 : vector<128x128xf32>
    %c0_23 = arith.constant 0 : index
    %c0_24 = arith.constant 0 : index
    %30 = vector.load %arg10[%c0_23, %c0_24] : memref<128x128xf32, #tpu.memory_space<vmem>>, vector<128x128xf32>
    tpu.vector_store %arg10[%c0_23, %c0_24], %29 {strides = array<i32>} : memref<128x128xf32, #tpu.memory_space<vmem>>, vector<128x128xf32>,
    return
  }
  func.func @transform_0(%arg0: i32) -> (i32, i32) {
    %c0_i32 = arith.constant 0 : i32
    %c0_i32_0 = arith.constant 0 : i32
    return %arg0, %c0_i32 : i32, i32
  }
  func.func @transform_1(%arg0: i32) -> (i32, i32) {
    %c0_i32 = arith.constant 0 : i32
    %c0_i32_0 = arith.constant 0 : i32
    %c0_i32_1 = arith.constant 0 : i32
    return %c0_i32, %c0_i32_0 : i32, i32
  }
  func.func @transform_2(%arg0: i32) -> (i32, i32) {
    %c0_i32 = arith.constant 0 : i32
    %c0_i32_0 = arith.constant 0 : i32
    %c0_i32_1 = arith.constant 0 : i32
    return %c0_i32, %c0_i32_0 : i32, i32
  }
  func.func @transform_3(%arg0: i32) -> (i32, i32) {
    %c0_i32 = arith.constant 0 : i32
    %c0_i32_0 = arith.constant 0 : i32
    %c0_i32_1 = arith.constant 0 : i32
    return %c0_i32, %c0_i32_0 : i32, i32
  }
  func.func @transform_4(%arg0: i32) -> (i32, i32) {
    %c0_i32 = arith.constant 0 : i32
    %c0_i32_0 = arith.constant 0 : i32
    %c0_i32_1 = arith.constant 0 : i32
    return %c0_i32, %c0_i32_0 : i32, i32
  }
  func.func @transform_5(%arg0: i32) -> (i32, i32) {
    %c0_i32 = arith.constant 0 : i32
    %c0_i32_0 = arith.constant 0 : i32
    %c0_i32_1 = arith.constant 0 : i32
    return %c0_i32, %c0_i32_0 : i32, i32
  }
  func.func @transform_6(%arg0: i32) -> (i32, i32) {
    %c0_i32 = arith.constant 0 : i32
    %c0_i32_0 = arith.constant 0 : i32
    %c0_i32_1 = arith.constant 0 : i32
    return %c0_i32, %c0_i32_0 : i32, i32
  }
  func.func @transform_7(%arg0: i32) -> (i32, i32) {
    %c0_i32 = arith.constant 0 : i32
    %c0_i32_0 = arith.constant 0 : i32
    %c0_i32_1 = arith.constant 0 : i32
    return %c0_i32, %c0_i32_0 : i32, i32
  }
  func.func @transform_8(%arg0: i32) -> (i32, i32) {
    %c0_i32 = arith.constant 0 : i32
    %c0_i32_0 = arith.constant 0 : i32
    %c0_i32_1 = arith.constant 0 : i32
    return %c0_i32, %c0_i32_0 : i32, i32
  }
  func.func @transform_9(%arg0: i32) -> (i32, i32) {
    %c0_i32 = arith.constant 0 : i32
    %c0_i32_0 = arith.constant 0 : i32
    return %arg0, %c0_i32 : i32, i32
  }
}

</mosaic_0001>

<bundles_post_ra>
// kernel: tpu_custom_call.1
= control target key start
LH: loop header
LB: loop body
LE: loop exit
PB: predicated region body
PF: predicated region fallthrough
CT: control target
= control target key end

     0   :  { %s3070_s0 = inlined_call_operand.hbm [shape: bf16[256,128], index: 0, kind: input, shape index: {}]   ;;  %s3071_s1 = inlined_call_operand.hbm [shape: bf16[128,256], index: 1, kind: input, shape index: {}]   ;;  %s3072_s2 = inlined_call_operand.vmem [shape: f32[1,256], index: 2, kind: input, shape index: {}]   ;;  %s3073_s3 = inlined_call_operand.hbm [shape: bf16[256,256], index: 3, kind: input, shape index: {}]   ;;  %s3074_s4 = inlined_call_operand.vmem [shape: f32[1,256], index: 4, kind: input, shape index: {}]   ;;  %s3075_s5 = inlined_call_operand.hbm [shape: bf16[256,256], index: 5, kind: input, shape index: {}]   ;;  %s3076_s6 = inlined_call_operand.vmem [shape: f32[1,256], index: 6, kind: input, shape index: {}]   ;;  %s3077_s7 = inlined_call_operand.hbm [shape: bf16[256,128], index: 7, kind: input, shape index: {}]   ;;  %s3078_s8 = inlined_call_operand.vmem [shape: f32[1,128], index: 8, kind: input, shape index: {}]   ;;  %s3079_s9 = inlined_call_operand.hbm [shape: f32[256,128], index: 9, kind: output, shape index: {}]  }
   0x1   :  { %3086 = sst [smem:[#allocation18_spill]] %s3079_s9 }
   0x2   :  { %14 = vsyncpa [#allocation3], 0 }
   0x3   :  { %16 = vsyncpa [#allocation3 + $0x1], 0 }
   0x4   :  { %17 = vsyncpa [#allocation6], 0 }
   0x5   :  { %18 = vsyncpa [#allocation9], 0 }
   0x6   :  { %19 = vsyncpa [#allocation4], 0 }
   0x7   :  { %21 = vsyncpa [#allocation4 + $0x1], 0  ;;  %s2576_s30 = smov 0   ;;  %s2578_s10 = smov 0  }
   0x8   :  { %s2580_s11 = smov 0   ;;  %s2582_s12 = smov 0  }
   0x9 LB: > { %3087 = sst [smem:[#allocation16_spill]] %s2499_s30  ;;  %s2597_s13 = sadd.s32 4294967295, %s2511_s12   ;;  %s2511_s12 = sphi %s2582_s12, %s3111_s12   ;;  %s2507_s11 = sphi %s2580_s11, %s3110_s11   ;;  %s2503_s10 = sphi %s2578_s10, %s3109_s10   ;;  %s2499_s30 = sphi %s2576_s30, %s3108_s30  }
   0xa   : > { %s1848_s14 = sadd.s32 4294967294, %s2511_s12   ;;  %p47_p0 = scmp.ne.s32.totalorder %s2503_s10, %s2499_s30 }
   0xb   : > { %p3080_p1 = scmp.eq.s32.totalorder %s2597_s13, 0  ;;  %p245_p3 = scmp.eq.s32.totalorder %s1848_s14, 1 }
   0xc   : > { %p1849_p5 = scmp.ge.s32.totalorder %s2511_s12, 1  ;;  %p252_p7 = scmp.lt.s32.totalorder %s2511_s12, 3 }
   0xd   : > { %p2606_p4 = por %p3080_p1, %p47_p0  ;;  %p2611_p6 = por %p245_p3, %p47_p0 }
   0xe   : > { %p2616_p8 = pnand %p1849_p5, %p252_p7  ;;  %s2513_s18 = smov [#allocation5]  }
   0xf   : > { %s3088_s15 = scalar_select %p2606_p4, 1, 0 }
  0x10   : > { %s3089_s16 = scalar_select %p2611_p6, 1, 0 }
  0x11   : > { %s3091_s17 = scalar_select %p2616_p8, 1, 0 }
  0x12   : > { %3090 = sst [smem:[#allocation17_spill]] %s3089_s16  ;;  %s264_s19 = sshll.u32 %s2513_s18, 4  ;;  %s2620_s19 = int_to_ptr.vmem [resolvable:$true] %s264_s19 }
  0x13   : > { %p2077_p9 = pneg %p2616_p8  ;;  %s2514_s21 = smov [#allocation8]  }
  0x14   : > { %s296_s22 = sshll.u32 %s2514_s21, 4  ;;  %s2515_s23 = smov [#allocation7]   ;;  %s2631_s22 = int_to_ptr.vmem [resolvable:$true] %s296_s22 }
  0x15   : > { %p2627_p11 = pnand %p2077_p9, %p3080_p1  ;;  %s2633_s24 = sshll.u32 %s2515_s23, 4  ;;  %s281_s24 = int_to_ptr.vmem [resolvable:$true] %s2633_s24 }
  0x16   : > { %s2295_s27 = scalar_lea.hbm %s3071_s1, 2048 }
  0x17   : > { %p2296_p12 = scmp.ne.s32.totalorder %s3071_s1, %s2295_s27  ;;  %p2643_p13 = pneg %p2627_p11 }
  0x18   : > { %p2302_p5 = scmp.lt.u32.totalorder %s2295_s27, %s3071_s1 }
  0x19   : > { %p2298_p0 = pnand %p2643_p13, %p2296_p12 }
  0x1b   : > { %p2299_p3 = pneg %p2298_p0 }
  0x1d   : > { %p2304_p7 = pnand %p2302_p5, %p2299_p3 }
  0x1f   : > { %2307 = shalt.err (!%p2304_p7)
}
  0x20   : > { %s2308_s23 = scalar_lea.vmem %s2620_s19, 2048  ;;  %p2316_p2 = scmp.lt.s32.totalorder %s2620_s19, %s2620_s19 }
  0x21   : > { %p2309_p9 = scmp.ne.s32.totalorder %s2620_s19, %s2308_s23  ;;  %p2317_p6 = scmp.lt.s32.totalorder %s2308_s23, %s2308_s23 }
  0x23   : > { %p2311_p10 = pnand %p2309_p9, %p2643_p13  ;;  %p2318_p12 = por %p2317_p6, %p2316_p2 }
  0x25   : > { %p2312_p1 = pneg %p2311_p10 }
  0x27   : > { %p2319_p0 = pnand %p2318_p12, %p2312_p1 }
  0x29   : > { %2322 = shalt.err (!%p2319_p0)
}
  0x2a   : > { %s2516_s25 = smov 128   ;;  %s2517_s26 = smov 8  }
  0x2b   : > { %2080 = dma.hbm_to_vmem [thread:$0]  (!%p2627_p11), %s3071_s1, 2048, %s2620_s19, [#allocation6], %s2516_s25, %s2516_s25, %s2517_s26  }
  0x2c   : > { %s2323_s21 = scalar_lea.hbm %s3075_s5, 4096 }
  0x2d   : > { %p2324_p1 = scmp.ne.s32.totalorder %s3075_s5, %s2323_s21  ;;  %p2330_p10 = scmp.lt.u32.totalorder %s2323_s21, %s3075_s5 }
  0x2f   : > { %p2326_p2 = pnand %p2324_p1, %p2643_p13 }
  0x31   : > { %p2327_p6 = pneg %p2326_p2 }
  0x33   : > { %p2332_p3 = pnand %p2330_p10, %p2327_p6 }
  0x35   : > { %2335 = shalt.err (!%p2332_p3)
}
  0x36   : > { %s2336_s19 = scalar_lea.vmem %s2631_s22, 4096  ;;  %p2344_p12 = scmp.lt.s32.totalorder %s2631_s22, %s2631_s22 }
  0x37   : > { %p2337_p5 = scmp.ne.s32.totalorder %s2631_s22, %s2336_s19  ;;  %p2345_p0 = scmp.lt.s32.totalorder %s2336_s19, %s2336_s19 }
  0x39   : > { %p2339_p7 = pnand %p2337_p5, %p2643_p13  ;;  %p2346_p1 = por %p2345_p0, %p2344_p12 }
  0x3b   : > { %p2340_p9 = pneg %p2339_p7 }
  0x3d   : > { %p2347_p2 = pnand %p2346_p1, %p2340_p9 }
  0x3f   : > { %2350 = shalt.err (!%p2347_p2)
}
  0x40   : > { %2086 = dma.hbm_to_vmem [thread:$0]  (!%p2627_p11), %s3075_s5, 4096, %s2631_s22, [#allocation9], %s2516_s25, %s2516_s25, %s2517_s26  }
  0x41   : > { %s2351_s28 = scalar_lea.hbm %s3073_s3, 4096 }
  0x42   : > { %p2352_p6 = scmp.ne.s32.totalorder %s3073_s3, %s2351_s28  ;;  %p2358_p5 = scmp.lt.u32.totalorder %s2351_s28, %s3073_s3 }
  0x44   : > { %p2354_p10 = pnand %p2352_p6, %p2643_p13 }
  0x46   : > { %p2355_p3 = pneg %p2354_p10 }
  0x48   : > { %p2360_p7 = pnand %p2358_p5, %p2355_p3 }
  0x4a   : > { %2363 = shalt.err (!%p2360_p7)
}
  0x4b   : > { %s2364_s19 = scalar_lea.vmem %s281_s24, 4096  ;;  %p2372_p1 = scmp.lt.s32.totalorder %s281_s24, %s281_s24 }
  0x4c   : > { %p2365_p9 = scmp.ne.s32.totalorder %s281_s24, %s2364_s19  ;;  %p2373_p2 = scmp.lt.s32.totalorder %s2364_s19, %s2364_s19 }
  0x4e   : > { %p2367_p12 = pnand %p2365_p9, %p2643_p13  ;;  %p2374_p4 = por %p2373_p2, %p2372_p1 }
  0x50   : > { %p2368_p0 = pneg %p2367_p12 }
  0x52   : > { %p2375_p8 = pnand %p2374_p4, %p2368_p0 }
  0x54   : > { %2378 = shalt.err (!%p2375_p8)
}
  0x55   : > { %2083 = dma.hbm_to_vmem [thread:$0]  (!%p2627_p11), %s3073_s3, 4096, %s281_s24, [#allocation6], %s2516_s25, %s2516_s25, %s2517_s26  }
  0x56   : > { %s2518_s30 = smov [#allocation10]   ;;  %s2379_s29 = scalar_lea.hbm %s3077_s7, 2048 }
  0x57   : > { %s312_s16 = sshll.u32 %s2518_s30, 4  ;;  %p2380_p4 = scmp.ne.s32.totalorder %s3077_s7, %s2379_s29  ;;  %s313_s16 = int_to_ptr.vmem [resolvable:$true] %s312_s16 }
  0x58   : > { %p2386_p10 = scmp.lt.u32.totalorder %s2379_s29, %s3077_s7 }
  0x59   : > { %p2382_p8 = pnand %p2380_p4, %p2643_p13 }
  0x5b   : > { %p2383_p6 = pneg %p2382_p8 }
  0x5d   : > { %p2388_p3 = pnand %p2386_p10, %p2383_p6 }
  0x5f   : > { %2391 = shalt.err (!%p2388_p3)
}
  0x60   : > { %s2392_s24 = scalar_lea.vmem %s313_s16, 2048  ;;  %p2400_p12 = scmp.lt.s32.totalorder %s313_s16, %s313_s16 }
  0x61   : > { %p2393_p5 = scmp.ne.s32.totalorder %s313_s16, %s2392_s24  ;;  %p2401_p0 = scmp.lt.s32.totalorder %s2392_s24, %s2392_s24 }
  0x63   : > { %p2395_p7 = pnand %p2393_p5, %p2643_p13  ;;  %p2402_p1 = por %p2401_p0, %p2400_p12 }
  0x65   : > { %p2396_p9 = pneg %p2395_p7 }
  0x67   : > { %p2403_p2 = pnand %p2402_p1, %p2396_p9 }
  0x69   : > { %2406 = shalt.err (!%p2403_p2)
}
  0x6a   : > { %s2519_s25 = smov 64   ;;  %s2520_s14 = smov 4  }
  0x6b   : > { %2089 = dma.hbm_to_vmem [thread:$0]  (!%p2627_p11), %s3077_s7, 2048, %s313_s16, [#allocation9], %s2519_s25, %s2519_s25, %s2520_s14  }
  0x6c   : > { %s2737_s9 = sadd.s32 1, %s2511_s12   ;;  %s34_s27 = sadd.s32 1, %s2507_s11 }
  0x6d   : > { %s31_s30 = ssub.s32 %s2511_s12, %s2737_s9  ;;  %p41_p4 = scmp.ne.s32.totalorder %s2507_s11, %s2503_s10 }
  0x6e   : > { %p32_p13 = scmp.eq.s32.totalorder %s31_s30, 0  ;;  %p42_p8 = scmp.eq.s32.totalorder %s2511_s12, 0 }
  0x6f   : > { %p3094_p10 = scmp.eq.s32.totalorder %s2597_s13, 1  ;;  %p2102_p5 = scmp.lt.s32.totalorder %s2511_s12, 2 }
  0x70   : > { %s2746_s28 = scalar_select %p32_p13, %s2507_s11, %s34_s27  }
  0x71   : > { %p43_p6 = por %p42_p8, %p41_p4  ;;  %p2750_p3 = por %p3094_p10, %p41_p4 }
  0x72   : > { %s329_s29 = sand.u32 1, %s2507_s11   ;;  %s1975_s16 = sshll.u32 %s2511_s12, 10 }
  0x73   : > { %s1855_s18 = sshll.u32 %s329_s29, 6  ;;  %s2760_s19 = scalar_lea.hbm %s3070_s0, %s1975_s16 }
  0x74   : > { %s333_s24 = scalar_lea.vmem [#allocation2], %s1855_s18  ;;  %p2764_p11 = pnand %p2102_p5, %p43_p6 }
  0x75   : > { %s340_s26 = sshll.u32 %s333_s24, 4  ;;  %s2768_s30 = scalar_lea.sflag [#allocation3], %s329_s29  ;;  %s2762_s26 = int_to_ptr.vmem [resolvable:$true] %s340_s26 }
  0x76   : > { %s2407_s27 = scalar_lea.hbm %s2760_s19, 1024  ;;  %p2409_p9 = pneg %p2764_p11 }
  0x77   : > { %p2408_p7 = scmp.ne.s32.totalorder %s2760_s19, %s2407_s27  ;;  %s2412_s21 = scalar_lea.hbm %s3070_s0, 2048 }
  0x78   : > { %p2413_p1 = scmp.lt.u32.totalorder %s2760_s19, %s3070_s0  ;;  %p2414_p2 = scmp.lt.u32.totalorder %s2412_s21, %s2407_s27 }
  0x79   : > { %p2410_p12 = pnand %p2409_p9, %p2408_p7  ;;  %p2416_p4 = scmp.lt.u32.totalorder %s2407_s27, %s2760_s19 }
  0x7a   : > { %p2415_p13 = por %p2414_p2, %p2413_p1 }
  0x7b   : > { %p2411_p0 = pneg %p2410_p12 }
  0x7c   : > { %p2417_p8 = por %p2416_p4, %p2415_p13 }
  0x7e   : > { %p2418_p6 = pnand %p2417_p8, %p2411_p0 }
  0x80   : > { %2421 = shalt.err (!%p2418_p6)
}
  0x81   : > { %s2422_s29 = scalar_lea.vmem %s2762_s26, 1024  ;;  %s2521_s18 = smov [#allocation2]  }
  0x82   : > { %p2423_p10 = scmp.ne.s32.totalorder %s2762_s26, %s2422_s29  ;;  %s2427_s16 = sshll.u32 %s2521_s18, 4  ;;  %s2428_s16 = int_to_ptr.vmem [resolvable:$false] %s2427_s16 }
  0x83   : > { %s2429_s23 = scalar_lea.vmem %s2428_s16, 2048  ;;  %p2430_p12 = scmp.lt.s32.totalorder %s2762_s26, %s2428_s16 }
  0x84   : > { %p2425_p5 = pnand %p2423_p10, %p2409_p9  ;;  %p2431_p1 = scmp.lt.s32.totalorder %s2429_s23, %s2422_s29 }
  0x86   : > { %p2426_p7 = pneg %p2425_p5  ;;  %p2432_p2 = por %p2431_p1, %p2430_p12 }
  0x88   : > { %p2433_p13 = pnand %p2432_p2, %p2426_p7 }
  0x8a   : > { %2436 = shalt.err (!%p2433_p13)
}
  0x8b   : > { %2093 = dma.hbm_to_vmem [thread:$0]  (!%p2764_p11), %s2760_s19, 1024, %s2762_s26, %s2768_s30, %s2519_s25, %s2519_s25, %s2520_s14  }
  0x8c   : > { %p3097_p9 = scmp.ne.s32.totalorder %s3091_s17, 0 }
  0x8d   : > { %s2802_s27 = sand.u32 (!%p3097_p9), 1, %s2503_s10   ;;  %p3098_p0 = scmp.ne.s32.totalorder (!%p3097_p9), %s3088_s15, 0 }
  0x8e   : > { %352 = sbr.rel (%p3097_p9) target bundleno = 1146 (0x47a), region = 56  ;;  %s1859_s21 = sshll.u32 (!%p3097_p9), %s2802_s27, 6 }
  0x8f   : > { %s355_s24 = scalar_lea.sflag (!%p3097_p9), [#allocation3], %s2802_s27  ;;  %s2806_s29 = scalar_lea.vmem (!%p3097_p9), [#allocation2], %s1859_s21 }
  0x95   : > { %2482 = dma.done.wait (%p3098_p0), %s355_s24, 1024  }
  0x96   : > { %2484 = vsyncadd (%p3098_p0), %s355_s24, 4294966272  ;;  %p3099_p11 = scmp.eq.s32.totalorder %s2597_s13, 0 }
  0x98   : > { %2486 = dma.done.wait (%p3099_p11), [#allocation6], 6144   ;;  %p3100_p4 = pmov %p3099_p11 }
  0x9a   : > { %2488 = vsyncadd (%p3100_p4), [#allocation6], 4294961152  ;;  %p3101_p8 = pmov %p3100_p4 }
  0x9b   : > { %p3102_p6 = pmov %p3100_p4 }
  0x9c   : > { %2490 = dma.done.wait (%p3101_p8), [#allocation9], 6144  }
  0x9d   : > { %2492 = vsyncadd (%p3102_p6), [#allocation9], 4294961152  ;;  %v2522_v0 = vmov 0   ;;  %v2151_v1 = vld [vmem:[#allocation5 + $0x4] ss:$8 sps:$4 sm:$0xff]   ;;  %v2177_v34 = vld [vmem:[%s2806_s29 + $0x10] sm:$0xff]  }
  0x9e   : > { %619 = vmatprep.mubr.bf16.mxu0 %v2522_v0  ;;  %v2153_v2 = vld [vmem:[#allocation5] ss:$8 sps:$4 sm:$0xff]   ;;  %587 = vmatprep.subr.bf16.mxu0 %v2151_v1  ;;  %v2154_v3 = vld [vmem:[#allocation5 + $0x14] ss:$8 sps:$4 sm:$0xff]   ;;  %v2156_v4 = vld [vmem:[#allocation5 + $0x10] ss:$8 sps:$4 sm:$0xff]  }
  0x9f   : > { %588 = vmatpush1.bf16.msra.mxu0 %v2153_v2  ;;  %v2157_v5 = vld [vmem:[#allocation5 + $0x24] ss:$8 sps:$4 sm:$0xff]   ;;  %v2159_v6 = vld [vmem:[#allocation5 + $0x20] ss:$8 sps:$4 sm:$0xff]   ;;  %v2160_v7 = vld [vmem:[#allocation5 + $0x34] ss:$8 sps:$4 sm:$0xff]  }
  0xa0   : > { %589 = vmatprep.subr.bf16.mxu0 %v2154_v3  ;;  %v2162_v8 = vld [vmem:[#allocation5 + $0x30] ss:$8 sps:$4 sm:$0xff]   ;;  %v2163_v9 = vld [vmem:[#allocation5 + $0x44] ss:$8 sps:$4 sm:$0xff]   ;;  %v2165_v10 = vld [vmem:[#allocation5 + $0x40] ss:$8 sps:$4 sm:$0xff]  }
  0xa1   : > { %v2166_v11 = vld [vmem:[#allocation5 + $0x54] ss:$8 sps:$4 sm:$0xff]   ;;  %v2168_v12 = vld [vmem:[#allocation5 + $0x50] ss:$8 sps:$4 sm:$0xff]   ;;  %v2169_v13 = vld [vmem:[#allocation5 + $0x64] ss:$8 sps:$4 sm:$0xff]  }
  0xa2   : > { %v2183_v14 = vld [vmem:[#allocation7 + $0x4] ss:$8 sps:$4 sm:$0xff]   ;;  %v2185_v15 = vld [vmem:[#allocation7] ss:$8 sps:$4 sm:$0xff]   ;;  %v2186_v16 = vld [vmem:[#allocation7 + $0x14] ss:$8 sps:$4 sm:$0xff]  }
  0xa3   : > { %590 = vmatpush1.bf16.msra.mxu0 %v2156_v4  ;;  %951 = vmatprep.subr.bf16.mxu1 %v2183_v14  ;;  %v2188_v17 = vld [vmem:[#allocation7 + $0x10] ss:$8 sps:$4 sm:$0xff]   ;;  %v2171_v18 = vld [vmem:[#allocation5 + $0x60] ss:$8 sps:$4 sm:$0xff]   ;;  %v2189_v19 = vld [vmem:[#allocation7 + $0x24] ss:$8 sps:$4 sm:$0xff]  }
  0xa4   : > { %591 = vmatprep.subr.bf16.mxu0 %v2157_v5  ;;  %952 = vmatpush1.bf16.msra.mxu1 %v2185_v15  ;;  %v2172_v20 = vld [vmem:[#allocation5 + $0x74] ss:$8 sps:$4 sm:$0xff]   ;;  %v2191_v21 = vld [vmem:[#allocation7 + $0x20] ss:$8 sps:$4 sm:$0xff]   ;;  %v2174_v22 = vld [vmem:[#allocation5 + $0x70] ss:$8 sps:$4 sm:$0xff]  }
  0xa5   : > { %953 = vmatprep.subr.bf16.mxu1 %v2186_v16  ;;  %v2192_v23 = vld [vmem:[#allocation7 + $0x34] ss:$8 sps:$4 sm:$0xff]   ;;  %v2175_v24 = vld [vmem:[%s2806_s29] sm:$0xff]   ;;  %v2194_v25 = vld [vmem:[#allocation7 + $0x30] ss:$8 sps:$4 sm:$0xff]   ;;  %s1864_s22 = sshll.u32 %s2802_s27, 7 }
  0xa6   : > { %v2195_v26 = vld [vmem:[#allocation7 + $0x44] ss:$8 sps:$4 sm:$0xff]   ;;  %v2197_v27 = vld [vmem:[#allocation7 + $0x40] ss:$8 sps:$4 sm:$0xff]   ;;  %v2198_v28 = vld [vmem:[#allocation7 + $0x54] ss:$8 sps:$4 sm:$0xff]  }
  0xa7   : > { %592 = vmatpush1.bf16.msra.mxu0 %v2159_v6  ;;  %v2176_v29 = vld [vmem:[%s2806_s29 + $0x8] sm:$0xff]   ;;  %v2200_v30 = vld [vmem:[#allocation7 + $0x50] ss:$8 sps:$4 sm:$0xff]   ;;  %v2204_v33 = vld [vmem:[#allocation7 + $0x74] ss:$8 sps:$4 sm:$0xff]   ;;  %s2986_s16 = scalar_lea.vmem [#allocation11], %s1864_s22 }
  0xa8   : > { %593 = vmatprep.subr.bf16.mxu0 %v2160_v7  ;;  %954 = vmatpush1.bf16.msra.mxu1 %v2188_v17  ;;  %v2201_v31 = vld [vmem:[#allocation7 + $0x64] ss:$8 sps:$4 sm:$0xff]   ;;  %v2203_v32 = vld [vmem:[#allocation7 + $0x60] ss:$8 sps:$4 sm:$0xff]   ;;  %v2206_v35 = vld [vmem:[#allocation7 + $0x70] ss:$8 sps:$4 sm:$0xff]  }
  0xa9   : > { %955 = vmatprep.subr.bf16.mxu1 %v2189_v19  ;;  %v2207_v36 = vld [vmem:[#allocation7 + $0x84] ss:$8 sps:$4 sm:$0xff]   ;;  %v2209_v37 = vld [vmem:[#allocation7 + $0x80] ss:$8 sps:$4 sm:$0xff]   ;;  %v2210_v38 = vld [vmem:[#allocation7 + $0x94] ss:$8 sps:$4 sm:$0xff]  }
  0xaa   : > { %v2178_v39 = vld [vmem:[%s2806_s29 + $0x18] sm:$0xff]   ;;  %v2213_v41 = vld [vmem:[#allocation7 + $0xa4] ss:$8 sps:$4 sm:$0xff]   ;;  %v2215_v42 = vld [vmem:[#allocation7 + $0xa0] ss:$8 sps:$4 sm:$0xff]   ;;  %s1976_s23 = sshll.u32 %s2597_s13, 11 }
  0xab   : > { %594 = vmatpush1.bf16.msra.mxu0 %v2162_v8  ;;  %v2212_v40 = vld [vmem:[#allocation7 + $0x90] ss:$8 sps:$4 sm:$0xff]   ;;  %v2216_v43 = vld [vmem:[#allocation7 + $0xb4] ss:$8 sps:$4 sm:$0xff]   ;;  %v2179_v44 = vld [vmem:[%s2806_s29 + $0x20] sm:$0xff]   ;;  %s1737_s21 = sshll.u32 %s2986_s16, 4  ;;  %s3023_s21 = int_to_ptr.vmem [resolvable:$true] %s1737_s21 }
  0xac   : > { %595 = vmatprep.subr.bf16.mxu0 %v2163_v9  ;;  %956 = vmatpush1.bf16.msra.mxu1 %v2191_v21  ;;  %v2218_v45 = vld [vmem:[#allocation7 + $0xb0] ss:$8 sps:$4 sm:$0xff]   ;;  %v2219_v46 = vld [vmem:[#allocation7 + $0xc4] ss:$8 sps:$4 sm:$0xff]   ;;  %v2221_v47 = vld [vmem:[#allocation7 + $0xc0] ss:$8 sps:$4 sm:$0xff]  }
  0xad   : > { %957 = vmatprep.subr.bf16.mxu1 %v2192_v23  ;;  %v2222_v48 = vld [vmem:[#allocation7 + $0xd4] ss:$8 sps:$4 sm:$0xff]   ;;  %v2180_v49 = vld [vmem:[%s2806_s29 + $0x28] sm:$0xff]   ;;  %v2224_v52 = vld [vmem:[#allocation7 + $0xd0] ss:$8 sps:$4 sm:$0xff]   ;;  %s3103_s15 = sld [smem:[#allocation18_spill]] }
  0xae   : > { %v2181_v50 = vld [vmem:[%s2806_s29 + $0x30] sm:$0xff]   ;;  %v2182_v51 = vld [vmem:[%s2806_s29 + $0x38] sm:$0xff]   ;;  %v2225_v53 = vld [vmem:[#allocation7 + $0xe4] ss:$8 sps:$4 sm:$0xff]   ;;  %s1724_s13 = scalar_lea.sflag [#allocation4], %s2802_s27  ;;  %s2437_s25 = scalar_lea.vmem %s3023_s21, 2048 }
  0xaf   : > { %596 = vmatpush1.bf16.msra.mxu0 %v2165_v10  ;;  %v2227_v54 = vld [vmem:[#allocation7 + $0xe0] ss:$8 sps:$4 sm:$0xff]   ;;  %v2228_v55 = vld [vmem:[#allocation7 + $0xf4] ss:$8 sps:$4 sm:$0xff]   ;;  %v2230_v56 = vld [vmem:[#allocation7 + $0xf0] ss:$8 sps:$4 sm:$0xff]   ;;  %p2438_p10 = scmp.ne.s32.totalorder %s3023_s21, %s2437_s25 }
  0xb0   : > { %597 = vmatprep.subr.bf16.mxu0 %v2166_v11  ;;  %958 = vmatpush1.bf16.msra.mxu1 %v2194_v25  ;;  %v2231_v57 = vld [vmem:[#allocation8] ss:$8 sps:$4 sm:$0xff]   ;;  %v2233_v58 = vld [vmem:[#allocation8 + $0x4] ss:$8 sps:$4 sm:$0xff]   ;;  %v2236_v59 = vld [vmem:[#allocation8 + $0x14] ss:$8 sps:$4 sm:$0xff]  }
  0xb1   : > { %959 = vmatprep.subr.bf16.mxu1 %v2195_v26  ;;  %v2234_v60 = vld [vmem:[#allocation8 + $0x10] ss:$8 sps:$4 sm:$0xff]   ;;  %v2239_v61 = vld [vmem:[#allocation8 + $0x24] ss:$8 sps:$4 sm:$0xff]   ;;  %v2237_v62 = vld [vmem:[#allocation8 + $0x20] ss:$8 sps:$4 sm:$0xff]   ;;  %p2439_p5 = pnand %p2438_p10, %p2750_p3 }
  0xb2   : > { %v2242_v63 = vld [vmem:[#allocation8 + $0x34] ss:$8 sps:$4 sm:$0xff]   ;;  %v2245_v1 = vld [vmem:[#allocation8 + $0x44] ss:$8 sps:$4 sm:$0xff]   ;;  %v2243_v2 = vld [vmem:[#allocation8 + $0x40] ss:$8 sps:$4 sm:$0xff]  }
  0xb3   : > { %598 = vmatpush1.bf16.msra.mxu0 %v2168_v12  ;;  %v2248_v3 = vld [vmem:[#allocation8 + $0x54] ss:$8 sps:$4 sm:$0xff]   ;;  %v2246_v4 = vld [vmem:[#allocation8 + $0x50] ss:$8 sps:$4 sm:$0xff]   ;;  %v2251_v5 = vld [vmem:[#allocation8 + $0x64] ss:$8 sps:$4 sm:$0xff]   ;;  %s3021_s17 = scalar_lea.hbm %s3103_s15, %s1976_s23  ;;  %p2440_p7 = pneg %p2439_p5 }
  0xb4   : > { %599 = vmatprep.subr.bf16.mxu0 %v2169_v13  ;;  %960 = vmatpush1.bf16.msra.mxu1 %v2197_v27  ;;  %v2249_v6 = vld [vmem:[#allocation8 + $0x60] ss:$8 sps:$4 sm:$0xff]   ;;  %v2254_v7 = vld [vmem:[#allocation8 + $0x74] ss:$8 sps:$4 sm:$0xff]   ;;  %v2252_v8 = vld [vmem:[#allocation8 + $0x70] ss:$8 sps:$4 sm:$0xff]  }
  0xb5   : > { %961 = vmatprep.subr.bf16.mxu1 %v2198_v28  ;;  %v2257_v9 = vld [vmem:[#allocation8 + $0x84] ss:$8 sps:$4 sm:$0xff]   ;;  %v2255_v10 = vld [vmem:[#allocation8 + $0x80] ss:$8 sps:$4 sm:$0xff]   ;;  %v2260_v11 = vld [vmem:[#allocation8 + $0x94] ss:$8 sps:$4 sm:$0xff]  }
  0xb6   : > { %v2258_v12 = vld [vmem:[#allocation8 + $0x90] ss:$8 sps:$4 sm:$0xff]   ;;  %v2263_v13 = vld [vmem:[#allocation8 + $0xa4] ss:$8 sps:$4 sm:$0xff]   ;;  %v2261_v14 = vld [vmem:[#allocation8 + $0xa0] ss:$8 sps:$4 sm:$0xff]  }
  0xb7   : > { %600 = vmatpush1.bf16.msra.mxu0 %v2171_v18  ;;  %v2266_v15 = vld [vmem:[#allocation8 + $0xb4] ss:$8 sps:$4 sm:$0xff]   ;;  %v2264_v16 = vld [vmem:[#allocation8 + $0xb0] ss:$8 sps:$4 sm:$0xff]   ;;  %v2269_v17 = vld [vmem:[#allocation8 + $0xc4] ss:$8 sps:$4 sm:$0xff]   ;;  %v449_v18 = vlaneseq }
  0xb8   : > { %601 = vmatprep.subr.bf16.mxu0 %v2172_v20  ;;  %962 = vmatpush1.bf16.msra.mxu1 %v2200_v30  ;;  %v2267_v19 = vld [vmem:[#allocation8 + $0xc0] ss:$8 sps:$4 sm:$0xff]   ;;  %v2272_v20 = vld [vmem:[#allocation8 + $0xd4] ss:$8 sps:$4 sm:$0xff]   ;;  %s2523_s14 = smov [#allocation11]  }
  0xb9   : > { %963 = vmatprep.subr.bf16.mxu1 %v2201_v31  ;;  %v450_v21 = vshrl.u32 %v449_v18, 7  ;;  %s2441_s19 = sshll.u32 %s2523_s14, 4  ;;  %s2442_s19 = int_to_ptr.vmem [resolvable:$false] %s2441_s19 }
  0xba   : > { %s2443_s26 = scalar_lea.vmem %s2442_s19, 4096  ;;  %p2444_p12 = scmp.lt.s32.totalorder %s3023_s21, %s2442_s19 }
  0xbb   : > { %602 = vmatpush1.bf16.msra.mxu0 %v2174_v22  ;;  %v2270_v22 = vld [vmem:[#allocation8 + $0xd0] ss:$8 sps:$4 sm:$0xff]   ;;  %v2836_v23 = vsub.s32 0, %v450_v21  ;;  %v2841_v25 = vsub.s32 1, %v450_v21  ;;  %p2445_p1 = scmp.lt.s32.totalorder %s2443_s26, %s2437_s25 }
  0xbc   : > { %964 = vmatpush1.bf16.msra.mxu1 %v2203_v32  ;;  %1315 = vmatprep.subr.bf16.mxu0 %v2233_v58 }
  0xbd   : > { %965 = vmatprep.subr.bf16.mxu1 %v2204_v33  ;;  %p2446_p2 = por %p2445_p1, %p2444_p12 }
  0xbe   : > { %620 = vmatmul.mubr.bf16.vlgmr.msra.gmra.mrb[0].mxu0 %v2175_v24  ;;  %v412_v24 = vld [vmem:[%s3072_s2] sm:$0x3] }
  0xbf   : > { %629 = vmatprep.mubr.bf16.mxu0 %v2522_v0  ;;  %1316 = vmatpush1.bf16.msra.mxu0 %v2231_v57  ;;  %v2844_v26 = vrot.slane %v412_v24, %v2836_v23  ;;  %v2847_v27 = vrot.slane %v412_v24, %v2841_v25  ;;  %p2447_p13 = pnand %p2446_p2, %p2440_p7 }
  0xc0   : > { %966 = vmatpush1.bf16.msra.mxu1 %v2206_v35  ;;  %1317 = vmatprep.subr.bf16.mxu0 %v2236_v59 }
  0xc1   : > { %967 = vmatprep.subr.bf16.mxu1 %v2207_v36 }
  0xc3   : > { %1318 = vmatpush1.bf16.msra.mxu0 %v2234_v60 }
  0xc4   : > { %968 = vmatpush1.bf16.msra.mxu1 %v2209_v37  ;;  %1319 = vmatprep.subr.bf16.mxu0 %v2239_v61 }
  0xc5   : > { %969 = vmatprep.subr.bf16.mxu1 %v2210_v38 }
  0xc6   : > { %630 = vmatmul.mubr.bf16.gmra.mrb[4].mxu0 %v2176_v29 }
  0xc7   : > { %639 = vmatprep.mubr.bf16.mxu0 %v2522_v0  ;;  %1320 = vmatpush1.bf16.msra.mxu0 %v2237_v62 }
  0xc8   : > { %970 = vmatpush1.bf16.msra.mxu1 %v2212_v40  ;;  %1321 = vmatprep.subr.bf16.mxu0 %v2242_v63 }
  0xc9   : > { %971 = vmatprep.subr.bf16.mxu1 %v2213_v41 }
  0xcc   : > { %972 = vmatpush1.bf16.msra.mxu1 %v2215_v42 }
  0xcd   : > { %973 = vmatprep.subr.bf16.mxu1 %v2216_v43 }
  0xce   : > { %640 = vmatmul.mubr.bf16.gmra.mrb[8].mxu0 %v2177_v34 }
  0xcf   : > { %649 = vmatprep.mubr.bf16.mxu0 %v2522_v0 }
  0xd0   : > { %974 = vmatpush1.bf16.msra.mxu1 %v2218_v45 }
  0xd1   : > { %975 = vmatprep.subr.bf16.mxu1 %v2219_v46 }
  0xd4   : > { %976 = vmatpush1.bf16.msra.mxu1 %v2221_v47 }
  0xd5   : > { %977 = vmatprep.subr.bf16.mxu1 %v2222_v48 }
  0xd6   : > { %650 = vmatmul.mubr.bf16.gmra.mrb[12].mxu0 %v2178_v39 }
  0xd7   : > { %659 = vmatprep.mubr.bf16.mxu0 %v2522_v0 }
  0xd8   : > { %978 = vmatpush1.bf16.msra.mxu1 %v2224_v52 }
  0xd9   : > { %979 = vmatprep.subr.bf16.mxu1 %v2225_v53 }
  0xdc   : > { %980 = vmatpush1.bf16.msra.mxu1 %v2227_v54 }
  0xdd   : > { %981 = vmatprep.subr.bf16.mxu1 %v2228_v55 }
  0xde   : > { %660 = vmatmul.mubr.bf16.gmra.mrb[16].mxu0 %v2179_v44 }
  0xdf   : > { %669 = vmatprep.mubr.bf16.mxu0 %v2522_v0 }
  0xe0   : > { %982 = vmatpush1.bf16.msra.mxu1 %v2230_v56 }
  0xe6   : > { %670 = vmatmul.mubr.bf16.gmra.mrb[20].mxu0 %v2180_v49 }
  0xe7   : > { %679 = vmatprep.mubr.bf16.mxu0 %v2522_v0 }
  0xee   : > { %680 = vmatmul.mubr.bf16.gmra.mrb[24].mxu0 %v2181_v50 }
  0xef   : > { %689 = vmatprep.mubr.bf16.mxu0 %v2522_v0  ;;  %v2240_v0 = vld [vmem:[#allocation8 + $0x30] ss:$8 sps:$4 sm:$0xff]  }
  0xf0   : > { %1322 = vmatpush1.bf16.msra.mxu0 %v2240_v0 }
  0xf1   : > { %1323 = vmatprep.subr.bf16.mxu0 %v2245_v1 }
  0xf4   : > { %1324 = vmatpush1.bf16.msra.mxu0 %v2243_v2 }
  0xf5   : > { %1325 = vmatprep.subr.bf16.mxu0 %v2248_v3 }
  0xf6   : > { %690 = vmatmul.mubr.bf16.gmra.mrb[28].mxu0 %v2182_v51 }
  0xf8   : > { %1326 = vmatpush1.bf16.msra.mxu0 %v2246_v4 }
  0xf9   : > { %1327 = vmatprep.subr.bf16.mxu0 %v2251_v5 }
  0xfc   : > { %1328 = vmatpush1.bf16.msra.mxu0 %v2249_v6 }
  0xfd   : > { %1329 = vmatprep.subr.bf16.mxu0 %v2254_v7 }
 0x100   : > { %1330 = vmatpush1.bf16.msra.mxu0 %v2252_v8 }
 0x101   : > { %1331 = vmatprep.subr.bf16.mxu0 %v2257_v9 }
 0x104   : > { %1332 = vmatpush1.bf16.msra.mxu0 %v2255_v10 }
 0x105   : > { %1333 = vmatprep.subr.bf16.mxu0 %v2260_v11 }
 0x108   : > { %1334 = vmatpush1.bf16.msra.mxu0 %v2258_v12 }
 0x109   : > { %1335 = vmatprep.subr.bf16.mxu0 %v2263_v13 }
 0x10c   : > { %1336 = vmatpush1.bf16.msra.mxu0 %v2261_v14 }
 0x10d   : > { %1337 = vmatprep.subr.bf16.mxu0 %v2266_v15 }
 0x110   : > { %1338 = vmatpush1.bf16.msra.mxu0 %v2264_v16 }
 0x111   : > { %1339 = vmatprep.subr.bf16.mxu0 %v2269_v17 }
 0x114   : > { %1340 = vmatpush1.bf16.msra.mxu0 %v2267_v19 }
 0x115   : > { %1341 = vmatprep.subr.bf16.mxu0 %v2272_v20 }
 0x118   : > { %1342 = vmatpush1.bf16.msra.mxu0 %v2270_v22 }
 0x191   : > { %v621_v28 = vpop.f32.mrb[0].mxu0 }
 0x192   : > { %v622_v29 = vadd.f32 %v621_v28, %v2844_v26  ;;  %v623_v30 = vpop.f32.mrb[1].mxu0 }
 0x193   : > { %v624_v31 = vadd.f32 %v623_v30, %v2847_v27  ;;  %v625_v32 = vpop.f32.mrb[2].mxu0 }
 0x194   : > { %v626_v33 = vadd.f32 %v625_v32, %v2844_v26  ;;  %v627_v34 = vpop.f32.mrb[3].mxu0  ;;  %v700_v36 = vmax.f32 %v622_v29, 0.0 }
 0x195   : > { %v628_v35 = vadd.f32 %v627_v34, %v2847_v27  ;;  %v701_v38 = vmax.f32 %v624_v31, 0.0 }
 0x196   : > { %v702_v37 = vmax.f32 %v626_v33, 0.0 }
 0x197   : > { %v703_v39 = vmax.f32 %v628_v35, 0.0 }
 0x198   : > { %v732_v40 = vpack.c.bf16 %v702_v37, %v700_v36 }
 0x199   : > { %v631_v41 = vpop.f32.mrb[4].mxu0  ;;  %v733_v42 = vpack.c.bf16 %v703_v39, %v701_v38 }
 0x19a   : > { %v632_v43 = vadd.f32 %v631_v41, %v2844_v26  ;;  %v633_v44 = vpop.f32.mrb[5].mxu0 }
 0x19b   : > { %v634_v45 = vadd.f32 %v633_v44, %v2847_v27  ;;  %v635_v46 = vpop.f32.mrb[6].mxu0  ;;  %983 = vmatprep.mubr.bf16.mxu1 %v733_v42 }
 0x19c   : > { %v636_v47 = vadd.f32 %v635_v46, %v2844_v26  ;;  %v637_v48 = vpop.f32.mrb[7].mxu0  ;;  %984 = vmatmul.mubr.bf16.vlgmr.msra.gmra.mrb[0].mxu1 %v732_v40  ;;  %v704_v50 = vmax.f32 %v632_v43, 0.0 }
 0x19d   : > { %v638_v49 = vadd.f32 %v637_v48, %v2847_v27  ;;  %v705_v52 = vmax.f32 %v634_v45, 0.0 }
 0x19e   : > { %v706_v51 = vmax.f32 %v636_v47, 0.0 }
 0x19f   : > { %v707_v53 = vmax.f32 %v638_v49, 0.0 }
 0x1a0   : > { %v734_v54 = vpack.c.bf16 %v706_v51, %v704_v50 }
 0x1a1   : > { %v735_v55 = vpack.c.bf16 %v707_v53, %v705_v52  ;;  %v641_v56 = vpop.f32.mrb[8].mxu0 }
 0x1a2   : > { %v642_v57 = vadd.f32 %v641_v56, %v2844_v26  ;;  %v643_v58 = vpop.f32.mrb[9].mxu0 }
 0x1a3   : > { %v644_v59 = vadd.f32 %v643_v58, %v2847_v27  ;;  %v645_v60 = vpop.f32.mrb[10].mxu0  ;;  %993 = vmatprep.mubr.bf16.mxu1 %v735_v55 }
 0x1a4   : > { %v646_v61 = vadd.f32 %v645_v60, %v2844_v26  ;;  %v647_v62 = vpop.f32.mrb[11].mxu0  ;;  %994 = vmatmul.mubr.bf16.gmra.mrb[4].mxu1 %v734_v54  ;;  %v708_v0 = vmax.f32 %v642_v57, 0.0 }
 0x1a5   : > { %v648_v63 = vadd.f32 %v647_v62, %v2847_v27  ;;  %v709_v2 = vmax.f32 %v644_v59, 0.0 }
 0x1a6   : > { %v710_v1 = vmax.f32 %v646_v61, 0.0 }
 0x1a7   : > { %v711_v3 = vmax.f32 %v648_v63, 0.0 }
 0x1a8   : > { %v736_v4 = vpack.c.bf16 %v710_v1, %v708_v0 }
 0x1a9   : > { %v737_v5 = vpack.c.bf16 %v711_v3, %v709_v2  ;;  %v651_v6 = vpop.f32.mrb[12].mxu0 }
 0x1aa   : > { %v652_v7 = vadd.f32 %v651_v6, %v2844_v26  ;;  %v653_v8 = vpop.f32.mrb[13].mxu0 }
 0x1ab   : > { %v654_v9 = vadd.f32 %v653_v8, %v2847_v27  ;;  %v655_v10 = vpop.f32.mrb[14].mxu0  ;;  %1003 = vmatprep.mubr.bf16.mxu1 %v737_v5 }
 0x1ac   : > { %v656_v11 = vadd.f32 %v655_v10, %v2844_v26  ;;  %v657_v12 = vpop.f32.mrb[15].mxu0  ;;  %1004 = vmatmul.mubr.bf16.gmra.mrb[8].mxu1 %v736_v4  ;;  %v712_v14 = vmax.f32 %v652_v7, 0.0 }
 0x1ad   : > { %v658_v13 = vadd.f32 %v657_v12, %v2847_v27  ;;  %v713_v16 = vmax.f32 %v654_v9, 0.0 }
 0x1ae   : > { %v714_v15 = vmax.f32 %v656_v11, 0.0 }
 0x1af   : > { %v715_v17 = vmax.f32 %v658_v13, 0.0 }
 0x1b0   : > { %v738_v18 = vpack.c.bf16 %v714_v15, %v712_v14 }
 0x1b1   : > { %v739_v19 = vpack.c.bf16 %v715_v17, %v713_v16  ;;  %v661_v20 = vpop.f32.mrb[16].mxu0  ;;  %v2275_v16 = vld [vmem:[#allocation8 + $0xe4] ss:$8 sps:$4 sm:$0xff]   ;;  %v2273_v17 = vld [vmem:[#allocation8 + $0xe0] ss:$8 sps:$4 sm:$0xff]  }
 0x1b2   : > { %v662_v21 = vadd.f32 %v661_v20, %v2844_v26  ;;  %v663_v22 = vpop.f32.mrb[17].mxu0  ;;  %1343 = vmatprep.subr.bf16.mxu0 %v2275_v16  ;;  %v2280_v20 = vld [vmem:[#allocation10] sm:$0xff]  }
 0x1b3   : > { %v664_v24 = vadd.f32 %v663_v22, %v2847_v27  ;;  %v665_v28 = vpop.f32.mrb[18].mxu0  ;;  %1013 = vmatprep.mubr.bf16.mxu1 %v739_v19  ;;  %1344 = vmatpush1.bf16.msra.mxu0 %v2273_v17  ;;  %v2276_v19 = vld [vmem:[#allocation8 + $0xf0] ss:$8 sps:$4 sm:$0xff]  }
 0x1b4   : > { %v666_v29 = vadd.f32 %v665_v28, %v2844_v26  ;;  %v667_v30 = vpop.f32.mrb[19].mxu0  ;;  %1014 = vmatmul.mubr.bf16.gmra.mrb[12].mxu1 %v738_v18  ;;  %v716_v32 = vmax.f32 %v662_v21, 0.0  ;;  %v2278_v18 = vld [vmem:[#allocation8 + $0xf4] ss:$8 sps:$4 sm:$0xff]   ;;  %v2282_v21 = vld [vmem:[#allocation10 + $0x8] sm:$0xff]  }
 0x1b5   : > { %v668_v31 = vadd.f32 %v667_v30, %v2847_v27  ;;  %v717_v34 = vmax.f32 %v664_v24, 0.0  ;;  %1345 = vmatprep.subr.bf16.mxu0 %v2278_v18  ;;  %v2283_v22 = vld [vmem:[#allocation10 + $0x50] sm:$0xff]   ;;  %v2285_v28 = vld [vmem:[#allocation10 + $0x58] sm:$0xff]   ;;  %v2883_v30 = vld [vmem:[#allocation10 + $0x60] sm:$0xff]  }
 0x1b6   : > { %v718_v33 = vmax.f32 %v666_v29, 0.0  ;;  %v2284_v24 = vld [vmem:[#allocation10 + $0x10] sm:$0xff]   ;;  %v2881_v29 = vld [vmem:[#allocation10 + $0x18] sm:$0xff]  }
 0x1b7   : > { %v719_v35 = vmax.f32 %v668_v31, 0.0  ;;  %1346 = vmatpush1.bf16.msra.mxu0 %v2276_v19  ;;  %v2887_v31 = vld [vmem:[#allocation10 + $0x20] sm:$0xff]  }
 0x1b8   : > { %v740_v36 = vpack.c.bf16 %v718_v33, %v716_v32  ;;  %v2889_v32 = vld [vmem:[#allocation10 + $0x68] sm:$0xff]   ;;  %v413_v33 = vld [vmem:[%s3074_s4] sm:$0x3] }
 0x1b9   : > { %v741_v37 = vpack.c.bf16 %v719_v35, %v717_v34  ;;  %v671_v38 = vpop.f32.mrb[20].mxu0  ;;  %v2897_v34 = vrot.slane %v413_v33, %v2836_v23  ;;  %v2900_v35 = vrot.slane %v413_v33, %v2841_v25 }
 0x1ba   : > { %v672_v39 = vadd.f32 %v671_v38, %v2844_v26  ;;  %v673_v40 = vpop.f32.mrb[21].mxu0 }
 0x1bb   : > { %v674_v41 = vadd.f32 %v673_v40, %v2847_v27  ;;  %v675_v42 = vpop.f32.mrb[22].mxu0  ;;  %1023 = vmatprep.mubr.bf16.mxu1 %v741_v37 }
 0x1bc   : > { %v676_v43 = vadd.f32 %v675_v42, %v2844_v26  ;;  %v677_v44 = vpop.f32.mrb[23].mxu0  ;;  %1024 = vmatmul.mubr.bf16.gmra.mrb[16].mxu1 %v740_v36  ;;  %v720_v46 = vmax.f32 %v672_v39, 0.0 }
 0x1bd   : > { %v678_v45 = vadd.f32 %v677_v44, %v2847_v27  ;;  %v721_v48 = vmax.f32 %v674_v41, 0.0 }
 0x1be   : > { %v722_v47 = vmax.f32 %v676_v43, 0.0 }
 0x1bf   : > { %v723_v49 = vmax.f32 %v678_v45, 0.0 }
 0x1c0   : > { %v742_v50 = vpack.c.bf16 %v722_v47, %v720_v46 }
 0x1c1   : > { %v743_v51 = vpack.c.bf16 %v723_v49, %v721_v48  ;;  %v681_v52 = vpop.f32.mrb[24].mxu0 }
 0x1c2   : > { %v682_v53 = vadd.f32 %v681_v52, %v2844_v26  ;;  %v683_v54 = vpop.f32.mrb[25].mxu0 }
 0x1c3   : > { %v684_v55 = vadd.f32 %v683_v54, %v2847_v27  ;;  %v685_v56 = vpop.f32.mrb[26].mxu0  ;;  %1033 = vmatprep.mubr.bf16.mxu1 %v743_v51 }
 0x1c4   : > { %v686_v57 = vadd.f32 %v685_v56, %v2844_v26  ;;  %v687_v58 = vpop.f32.mrb[27].mxu0  ;;  %1034 = vmatmul.mubr.bf16.gmra.mrb[20].mxu1 %v742_v50  ;;  %v724_v60 = vmax.f32 %v682_v53, 0.0 }
 0x1c5   : > { %v688_v59 = vadd.f32 %v687_v58, %v2847_v27  ;;  %v725_v62 = vmax.f32 %v684_v55, 0.0 }
 0x1c6   : > { %v726_v61 = vmax.f32 %v686_v57, 0.0 }
 0x1c7   : > { %v727_v63 = vmax.f32 %v688_v59, 0.0 }
 0x1c8   : > { %v744_v0 = vpack.c.bf16 %v726_v61, %v724_v60 }
 0x1c9   : > { %v745_v1 = vpack.c.bf16 %v727_v63, %v725_v62  ;;  %v691_v2 = vpop.f32.mrb[28].mxu0 }
 0x1ca   : > { %v692_v3 = vadd.f32 %v691_v2, %v2844_v26  ;;  %v693_v4 = vpop.f32.mrb[29].mxu0 }
 0x1cb   : > { %v694_v5 = vadd.f32 %v693_v4, %v2847_v27  ;;  %v695_v6 = vpop.f32.mrb[30].mxu0  ;;  %1043 = vmatprep.mubr.bf16.mxu1 %v745_v1 }
 0x1cc   : > { %v696_v7 = vadd.f32 %v695_v6, %v2844_v26  ;;  %v697_v8 = vpop.f32.mrb[31].mxu0  ;;  %1044 = vmatmul.mubr.bf16.gmra.mrb[24].mxu1 %v744_v0  ;;  %v728_v10 = vmax.f32 %v692_v3, 0.0  ;;  %v2279_v26 = vld [vmem:[#allocation10 + $0x40] sm:$0xff]  }
 0x1cd   : > { %v698_v9 = vadd.f32 %v697_v8, %v2847_v27  ;;  %v729_v12 = vmax.f32 %v694_v5, 0.0  ;;  %2041 = vmatprep.subr.bf16.mxu1 %v2279_v26  ;;  %v2281_v27 = vld [vmem:[#allocation10 + $0x48] sm:$0xff]   ;;  %1977 = vmatprep.subr.bf16.mxu0 %v2279_v26 }
 0x1ce   : > { %v730_v11 = vmax.f32 %v696_v7, 0.0  ;;  %2049 = vmatpush3.bf16.msra.mxu1 %v2280_v20 }
 0x1cf   : > { %v731_v13 = vmax.f32 %v698_v9, 0.0  ;;  %2042 = vmatprep.subr.bf16.mxu1 %v2281_v27 }
 0x1d0   : > { %v746_v14 = vpack.c.bf16 %v730_v11, %v728_v10 }
 0x1d1   : > { %v747_v15 = vpack.c.bf16 %v731_v13, %v729_v12 }
 0x1d2   : > { %2050 = vmatpush3.bf16.msra.mxu1 %v2282_v21 }
 0x1d3   : > { %1053 = vmatprep.mubr.bf16.mxu1 %v747_v15  ;;  %2043 = vmatprep.subr.bf16.mxu1 %v2283_v22 }
 0x1d4   : > { %1054 = vmatmul.mubr.bf16.gmra.mrb[28].mxu1 %v746_v14 }
 0x1d6   : > { %2051 = vmatpush3.bf16.msra.mxu1 %v2284_v24 }
 0x1d7   : > { %2044 = vmatprep.subr.bf16.mxu1 %v2285_v28 }
 0x1da   : > { %2052 = vmatpush3.bf16.msra.mxu1 %v2881_v29 }
 0x1db   : > { %2045 = vmatprep.subr.bf16.mxu1 %v2883_v30 }
 0x1de   : > { %2053 = vmatpush3.bf16.msra.mxu1 %v2887_v31 }
 0x1df   : > { %2046 = vmatprep.subr.bf16.mxu1 %v2889_v32 }
 0x26f   : > { %v985_v36 = vpop.f32.mrb[0].mxu1 }
 0x270   : > { %v986_v37 = vadd.f32 %v985_v36, %v2897_v34  ;;  %v987_v38 = vpop.f32.mrb[1].mxu1 }
 0x271   : > { %v988_v39 = vadd.f32 %v987_v38, %v2900_v35  ;;  %v989_v40 = vpop.f32.mrb[2].mxu1 }
 0x272   : > { %v990_v41 = vadd.f32 %v989_v40, %v2897_v34  ;;  %v991_v42 = vpop.f32.mrb[3].mxu1  ;;  %v1064_v44 = vmax.f32 %v986_v37, 0.0 }
 0x273   : > { %v992_v43 = vadd.f32 %v991_v42, %v2900_v35  ;;  %v1065_v46 = vmax.f32 %v988_v39, 0.0 }
 0x274   : > { %v1066_v45 = vmax.f32 %v990_v41, 0.0 }
 0x275   : > { %v1067_v47 = vmax.f32 %v992_v43, 0.0 }
 0x276   : > { %v1096_v48 = vpack.c.bf16 %v1066_v45, %v1064_v44 }
 0x277   : > { %v1097_v49 = vpack.c.bf16 %v1067_v47, %v1065_v46  ;;  %v995_v50 = vpop.f32.mrb[4].mxu1 }
 0x278   : > { %v996_v51 = vadd.f32 %v995_v50, %v2897_v34  ;;  %v997_v52 = vpop.f32.mrb[5].mxu1 }
 0x279   : > { %v998_v53 = vadd.f32 %v997_v52, %v2900_v35  ;;  %v999_v54 = vpop.f32.mrb[6].mxu1  ;;  %1347 = vmatprep.mubr.bf16.mxu0 %v1097_v49 }
 0x27a   : > { %v1000_v55 = vadd.f32 %v999_v54, %v2897_v34  ;;  %v1001_v56 = vpop.f32.mrb[7].mxu1  ;;  %1348 = vmatmul.mubr.bf16.vlgmr.msra.gmra.mrb[32].mxu0 %v1096_v48  ;;  %v1068_v58 = vmax.f32 %v996_v51, 0.0 }
 0x27b   : > { %v1002_v57 = vadd.f32 %v1001_v56, %v2900_v35  ;;  %1978 = vmatpush3.bf16.msra.mxu0 %v2280_v20  ;;  %v1069_v60 = vmax.f32 %v998_v53, 0.0 }
 0x27c   : > { %v1070_v59 = vmax.f32 %v1000_v55, 0.0  ;;  %1979 = vmatprep.subr.bf16.mxu0 %v2281_v27 }
 0x27d   : > { %v1071_v61 = vmax.f32 %v1002_v57, 0.0 }
 0x27e   : > { %v1098_v62 = vpack.c.bf16 %v1070_v59, %v1068_v58 }
 0x27f   : > { %v1099_v63 = vpack.c.bf16 %v1071_v61, %v1069_v60  ;;  %v1005_v0 = vpop.f32.mrb[8].mxu1  ;;  %1980 = vmatpush3.bf16.msra.mxu0 %v2282_v21 }
 0x280   : > { %v1006_v1 = vadd.f32 %v1005_v0, %v2897_v34  ;;  %v1007_v2 = vpop.f32.mrb[9].mxu1  ;;  %1981 = vmatprep.subr.bf16.mxu0 %v2283_v22 }
 0x281   : > { %v1008_v3 = vadd.f32 %v1007_v2, %v2900_v35  ;;  %v1009_v4 = vpop.f32.mrb[10].mxu1  ;;  %1357 = vmatprep.mubr.bf16.mxu0 %v1099_v63 }
 0x282   : > { %v1010_v5 = vadd.f32 %v1009_v4, %v2897_v34  ;;  %v1011_v6 = vpop.f32.mrb[11].mxu1  ;;  %1358 = vmatmul.mubr.bf16.gmra.mrb[36].mxu0 %v1098_v62  ;;  %v1072_v8 = vmax.f32 %v1006_v1, 0.0 }
 0x283   : > { %v1012_v7 = vadd.f32 %v1011_v6, %v2900_v35  ;;  %1982 = vmatpush3.bf16.msra.mxu0 %v2284_v24  ;;  %v1073_v10 = vmax.f32 %v1008_v3, 0.0 }
 0x284   : > { %v1074_v9 = vmax.f32 %v1010_v5, 0.0  ;;  %1983 = vmatprep.subr.bf16.mxu0 %v2285_v28 }
 0x285   : > { %v1075_v11 = vmax.f32 %v1012_v7, 0.0 }
 0x286   : > { %v1100_v12 = vpack.c.bf16 %v1074_v9, %v1072_v8 }
 0x287   : > { %v1101_v13 = vpack.c.bf16 %v1075_v11, %v1073_v10  ;;  %v1015_v14 = vpop.f32.mrb[12].mxu1  ;;  %1984 = vmatpush3.bf16.msra.mxu0 %v2881_v29 }
 0x288   : > { %v1016_v15 = vadd.f32 %v1015_v14, %v2897_v34  ;;  %v1017_v16 = vpop.f32.mrb[13].mxu1  ;;  %1985 = vmatprep.subr.bf16.mxu0 %v2883_v30 }
 0x289   : > { %v1018_v17 = vadd.f32 %v1017_v16, %v2900_v35  ;;  %v1019_v18 = vpop.f32.mrb[14].mxu1  ;;  %1367 = vmatprep.mubr.bf16.mxu0 %v1101_v13 }
 0x28a   : > { %v1020_v19 = vadd.f32 %v1019_v18, %v2897_v34  ;;  %v1021_v26 = vpop.f32.mrb[15].mxu1  ;;  %1368 = vmatmul.mubr.bf16.gmra.mrb[40].mxu0 %v1100_v12  ;;  %v1076_v27 = vmax.f32 %v1016_v15, 0.0 }
 0x28b   : > { %v1022_v20 = vadd.f32 %v1021_v26, %v2900_v35  ;;  %1986 = vmatpush3.bf16.msra.mxu0 %v2887_v31  ;;  %v1077_v22 = vmax.f32 %v1018_v17, 0.0 }
 0x28c   : > { %v1078_v21 = vmax.f32 %v1020_v19, 0.0  ;;  %1987 = vmatprep.subr.bf16.mxu0 %v2889_v32 }
 0x28d   : > { %v1079_v24 = vmax.f32 %v1022_v20, 0.0 }
 0x28e   : > { %v1102_v28 = vpack.c.bf16 %v1078_v21, %v1076_v27 }
 0x28f   : > { %v1103_v29 = vpack.c.bf16 %v1079_v24, %v1077_v22  ;;  %v1025_v30 = vpop.f32.mrb[16].mxu1  ;;  %v2290_v22 = vld [vmem:[#allocation10 + $0x28] sm:$0xff]   ;;  %v2291_v24 = vld [vmem:[#allocation10 + $0x70] sm:$0xff]  }
 0x290   : > { %v1026_v33 = vadd.f32 %v1025_v30, %v2897_v34  ;;  %v1027_v36 = vpop.f32.mrb[17].mxu1  ;;  %1988 = vmatpush3.bf16.msra.mxu0 %v2290_v22  ;;  %2054 = vmatpush3.bf16.msra.mxu1 %v2290_v22 }
 0x291   : > { %v1028_v37 = vadd.f32 %v1027_v36, %v2900_v35  ;;  %v1029_v38 = vpop.f32.mrb[18].mxu1  ;;  %1377 = vmatprep.mubr.bf16.mxu0 %v1103_v29  ;;  %1989 = vmatprep.subr.bf16.mxu0 %v2291_v24  ;;  %v2294_v29 = vld [vmem:[#allocation10 + $0x38] sm:$0xff]  }
 0x292   : > { %v1030_v39 = vadd.f32 %v1029_v38, %v2897_v34  ;;  %v1031_v40 = vpop.f32.mrb[19].mxu1  ;;  %1378 = vmatmul.mubr.bf16.gmra.mrb[44].mxu0 %v1102_v28  ;;  %v1080_v41 = vmax.f32 %v1026_v33, 0.0  ;;  %v2292_v28 = vld [vmem:[#allocation10 + $0x30] sm:$0xff]   ;;  %2047 = vmatprep.subr.bf16.mxu1 %v2291_v24 }
 0x293   : > { %v1032_v31 = vadd.f32 %v1031_v40, %v2900_v35  ;;  %v1081_v42 = vmax.f32 %v1028_v37, 0.0 }
 0x294   : > { %v1082_v32 = vmax.f32 %v1030_v39, 0.0  ;;  %1990 = vmatpush3.bf16.msra.mxu0 %v2292_v28  ;;  %2055 = vmatpush3.bf16.msra.mxu1 %v2292_v28 }
 0x295   : > { %v1083_v43 = vmax.f32 %v1032_v31, 0.0 }
 0x296   : > { %v1104_v44 = vpack.c.bf16 %v1082_v32, %v1080_v41 }
 0x297   : > { %v1105_v45 = vpack.c.bf16 %v1083_v43, %v1081_v42  ;;  %v1035_v46 = vpop.f32.mrb[20].mxu1 }
 0x298   : > { %v1036_v47 = vadd.f32 %v1035_v46, %v2897_v34  ;;  %v1037_v48 = vpop.f32.mrb[21].mxu1 }
 0x299   : > { %v1038_v49 = vadd.f32 %v1037_v48, %v2900_v35  ;;  %v1039_v50 = vpop.f32.mrb[22].mxu1  ;;  %1387 = vmatprep.mubr.bf16.mxu0 %v1105_v45 }
 0x29a   : > { %v1040_v51 = vadd.f32 %v1039_v50, %v2897_v34  ;;  %v1041_v52 = vpop.f32.mrb[23].mxu1  ;;  %1388 = vmatmul.mubr.bf16.gmra.mrb[48].mxu0 %v1104_v44  ;;  %v1084_v54 = vmax.f32 %v1036_v47, 0.0 }
 0x29b   : > { %v1042_v53 = vadd.f32 %v1041_v52, %v2900_v35  ;;  %v1085_v56 = vmax.f32 %v1038_v49, 0.0 }
 0x29c   : > { %v1086_v55 = vmax.f32 %v1040_v51, 0.0 }
 0x29d   : > { %v1087_v57 = vmax.f32 %v1042_v53, 0.0 }
 0x29e   : > { %v1106_v58 = vpack.c.bf16 %v1086_v55, %v1084_v54 }
 0x29f   : > { %v1107_v59 = vpack.c.bf16 %v1087_v57, %v1085_v56  ;;  %v1045_v60 = vpop.f32.mrb[24].mxu1 }
 0x2a0   : > { %v1046_v61 = vadd.f32 %v1045_v60, %v2897_v34  ;;  %v1047_v62 = vpop.f32.mrb[25].mxu1 }
 0x2a1   : > { %v1048_v63 = vadd.f32 %v1047_v62, %v2900_v35  ;;  %v1049_v0 = vpop.f32.mrb[26].mxu1  ;;  %1397 = vmatprep.mubr.bf16.mxu0 %v1107_v59 }
 0x2a2   : > { %v1050_v1 = vadd.f32 %v1049_v0, %v2897_v34  ;;  %v1051_v2 = vpop.f32.mrb[27].mxu1  ;;  %1398 = vmatmul.mubr.bf16.gmra.mrb[52].mxu0 %v1106_v58  ;;  %v1088_v4 = vmax.f32 %v1046_v61, 0.0 }
 0x2a3   : > { %v1052_v3 = vadd.f32 %v1051_v2, %v2900_v35  ;;  %v1089_v6 = vmax.f32 %v1048_v63, 0.0 }
 0x2a4   : > { %v1090_v5 = vmax.f32 %v1050_v1, 0.0 }
 0x2a5   : > { %v1091_v7 = vmax.f32 %v1052_v3, 0.0 }
 0x2a6   : > { %v1108_v8 = vpack.c.bf16 %v1090_v5, %v1088_v4 }
 0x2a7   : > { %v1109_v9 = vpack.c.bf16 %v1091_v7, %v1089_v6  ;;  %v1055_v10 = vpop.f32.mrb[28].mxu1 }
 0x2a8   : > { %v1056_v11 = vadd.f32 %v1055_v10, %v2897_v34  ;;  %v1057_v12 = vpop.f32.mrb[29].mxu1 }
 0x2a9   : > { %v1058_v13 = vadd.f32 %v1057_v12, %v2900_v35  ;;  %v1059_v14 = vpop.f32.mrb[30].mxu1  ;;  %1407 = vmatprep.mubr.bf16.mxu0 %v1109_v9 }
 0x2aa   : > { %v1060_v15 = vadd.f32 %v1059_v14, %v2897_v34  ;;  %v1061_v16 = vpop.f32.mrb[31].mxu1  ;;  %1408 = vmatmul.mubr.bf16.gmra.mrb[56].mxu0 %v1108_v8  ;;  %v1092_v18 = vmax.f32 %v1056_v11, 0.0  ;;  %v2293_v34 = vld [vmem:[#allocation10 + $0x78] sm:$0xff]  }
 0x2ab   : > { %v1062_v17 = vadd.f32 %v1061_v16, %v2900_v35  ;;  %v1093_v26 = vmax.f32 %v1058_v13, 0.0  ;;  %1991 = vmatprep.subr.bf16.mxu0 %v2293_v34  ;;  %2048 = vmatprep.subr.bf16.mxu1 %v2293_v34  ;;  %v414_v35 = vld [vmem:[%s3076_s6] sm:$0x3] }
 0x2ac   : > { %v1094_v19 = vmax.f32 %v1060_v15, 0.0  ;;  %1992 = vmatpush3.bf16.msra.mxu0 %v2294_v29  ;;  %2056 = vmatpush3.bf16.msra.mxu1 %v2294_v29  ;;  %v2942_v30 = vrot.slane %v414_v35, %v2836_v23  ;;  %v2945_v33 = vrot.slane %v414_v35, %v2841_v25 }
 0x2ad   : > { %v1095_v20 = vmax.f32 %v1062_v17, 0.0 }
 0x2ae   : > { %v1110_v27 = vpack.c.bf16 %v1094_v19, %v1092_v18 }
 0x2af   : > { %v1111_v21 = vpack.c.bf16 %v1095_v20, %v1093_v26 }
 0x2b1   : > { %1417 = vmatprep.mubr.bf16.mxu0 %v1111_v21 }
 0x2b2   : > { %1418 = vmatmul.mubr.bf16.gmra.mrb[60].mxu0 %v1110_v27 }
 0x34d   : > { %v1349_v36 = vpop.f32.mrb[32].mxu0 }
 0x34e   : > { %v1350_v37 = vadd.f32 %v1349_v36, %v2942_v30  ;;  %v1351_v38 = vpop.f32.mrb[33].mxu0 }
 0x34f   : > { %v1352_v39 = vadd.f32 %v1351_v38, %v2945_v33  ;;  %v1353_v40 = vpop.f32.mrb[34].mxu0 }
 0x350   : > { %v1354_v31 = vadd.f32 %v1353_v40, %v2942_v30  ;;  %v1355_v41 = vpop.f32.mrb[35].mxu0  ;;  %v1428_v42 = vmax.f32 %v1350_v37, 0.0 }
 0x351   : > { %v1356_v32 = vadd.f32 %v1355_v41, %v2945_v33  ;;  %v1429_v44 = vmax.f32 %v1352_v39, 0.0 }
 0x352   : > { %v1430_v43 = vmax.f32 %v1354_v31, 0.0 }
 0x353   : > { %v1431_v23 = vmax.f32 %v1356_v32, 0.0 }
 0x354   : > { %v1460_v45 = vpack.c.bf16 %v1430_v43, %v1428_v42 }
 0x355   : > { %v1461_v46 = vpack.c.bf16 %v1431_v23, %v1429_v44  ;;  %v1359_v25 = vpop.f32.mrb[36].mxu0 }
 0x356   : > { %v1360_v47 = vadd.f32 %v1359_v25, %v2942_v30  ;;  %v1361_v48 = vpop.f32.mrb[37].mxu0 }
 0x357   : > { %v1362_v49 = vadd.f32 %v1361_v48, %v2945_v33  ;;  %v1363_v50 = vpop.f32.mrb[38].mxu0  ;;  %1642 = vmatprep.mubr.bf16.mxu0 %v1461_v46 }
 0x358   : > { %v1364_v51 = vadd.f32 %v1363_v50, %v2942_v30  ;;  %v1365_v52 = vpop.f32.mrb[39].mxu0  ;;  %1643 = vmatmul.mubr.bf16.vlgmr.msra.gmra.mrb[64].mxu0 %v1460_v45  ;;  %v1432_v54 = vmax.f32 %v1360_v47, 0.0 }
 0x359   : > { %v1366_v53 = vadd.f32 %v1365_v52, %v2945_v33  ;;  %v1433_v56 = vmax.f32 %v1362_v49, 0.0 }
 0x35a   : > { %v1434_v55 = vmax.f32 %v1364_v51, 0.0 }
 0x35b   : > { %v1435_v57 = vmax.f32 %v1366_v53, 0.0 }
 0x35c   : > { %v1462_v58 = vpack.c.bf16 %v1434_v55, %v1432_v54 }
 0x35d   : > { %v1463_v59 = vpack.c.bf16 %v1435_v57, %v1433_v56  ;;  %v1369_v60 = vpop.f32.mrb[40].mxu0 }
 0x35e   : > { %v1370_v61 = vadd.f32 %v1369_v60, %v2942_v30  ;;  %v1371_v62 = vpop.f32.mrb[41].mxu0 }
 0x35f   : > { %v1372_v63 = vadd.f32 %v1371_v62, %v2945_v33  ;;  %v1373_v0 = vpop.f32.mrb[42].mxu0  ;;  %1650 = vmatprep.mubr.bf16.mxu0 %v1463_v59 }
 0x360   : > { %v1374_v1 = vadd.f32 %v1373_v0, %v2942_v30  ;;  %v1375_v2 = vpop.f32.mrb[43].mxu0  ;;  %1651 = vmatmul.mubr.bf16.gmra.mrb[68].mxu0 %v1462_v58  ;;  %v1436_v4 = vmax.f32 %v1370_v61, 0.0 }
 0x361   : > { %v1376_v3 = vadd.f32 %v1375_v2, %v2945_v33  ;;  %v1437_v6 = vmax.f32 %v1372_v63, 0.0 }
 0x362   : > { %v1438_v5 = vmax.f32 %v1374_v1, 0.0 }
 0x363   : > { %v1439_v7 = vmax.f32 %v1376_v3, 0.0 }
 0x364   : > { %v1464_v8 = vpack.c.bf16 %v1438_v5, %v1436_v4 }
 0x365   : > { %v1465_v9 = vpack.c.bf16 %v1439_v7, %v1437_v6  ;;  %v1379_v10 = vpop.f32.mrb[44].mxu0 }
 0x366   : > { %v1380_v11 = vadd.f32 %v1379_v10, %v2942_v30  ;;  %v1381_v12 = vpop.f32.mrb[45].mxu0 }
 0x367   : > { %v1382_v13 = vadd.f32 %v1381_v12, %v2945_v33  ;;  %v1383_v14 = vpop.f32.mrb[46].mxu0  ;;  %1658 = vmatprep.mubr.bf16.mxu1 %v1465_v9 }
 0x368   : > { %v1384_v15 = vadd.f32 %v1383_v14, %v2942_v30  ;;  %v1385_v16 = vpop.f32.mrb[47].mxu0  ;;  %1659 = vmatmul.mubr.bf16.vlgmr.msra.gmra.mrb[32].mxu1 %v1464_v8  ;;  %v1440_v18 = vmax.f32 %v1380_v11, 0.0 }
 0x369   : > { %v1386_v17 = vadd.f32 %v1385_v16, %v2945_v33  ;;  %v1441_v26 = vmax.f32 %v1382_v13, 0.0 }
 0x36a   : > { %v1442_v19 = vmax.f32 %v1384_v15, 0.0 }
 0x36b   : > { %v1443_v20 = vmax.f32 %v1386_v17, 0.0 }
 0x36c   : > { %v1466_v27 = vpack.c.bf16 %v1442_v19, %v1440_v18  ;;  %v2983_v19 = vld [vmem:[%s3078_s8] ss:$0 sm:$0xff] }
 0x36d   : > { %v1467_v21 = vpack.c.bf16 %v1443_v20, %v1441_v26  ;;  %v1389_v22 = vpop.f32.mrb[48].mxu0 }
 0x36e   : > { %v1390_v24 = vadd.f32 %v1389_v22, %v2942_v30  ;;  %v1391_v28 = vpop.f32.mrb[49].mxu0 }
 0x36f   : > { %v1392_v34 = vadd.f32 %v1391_v28, %v2945_v33  ;;  %v1393_v29 = vpop.f32.mrb[50].mxu0  ;;  %1666 = vmatprep.mubr.bf16.mxu1 %v1467_v21 }
 0x370   : > { %v1394_v35 = vadd.f32 %v1393_v29, %v2942_v30  ;;  %v1395_v36 = vpop.f32.mrb[51].mxu0  ;;  %1667 = vmatmul.mubr.bf16.gmra.mrb[36].mxu1 %v1466_v27  ;;  %v1444_v38 = vmax.f32 %v1390_v24, 0.0 }
 0x371   : > { %v1396_v37 = vadd.f32 %v1395_v36, %v2945_v33  ;;  %v1445_v40 = vmax.f32 %v1392_v34, 0.0 }
 0x372   : > { %v1446_v39 = vmax.f32 %v1394_v35, 0.0 }
 0x373   : > { %v1447_v31 = vmax.f32 %v1396_v37, 0.0 }
 0x374   : > { %v1468_v41 = vpack.c.bf16 %v1446_v39, %v1444_v38 }
 0x375   : > { %v1469_v32 = vpack.c.bf16 %v1447_v31, %v1445_v40  ;;  %v1399_v42 = vpop.f32.mrb[52].mxu0 }
 0x376   : > { %v1400_v43 = vadd.f32 %v1399_v42, %v2942_v30  ;;  %v1401_v44 = vpop.f32.mrb[53].mxu0 }
 0x377   : > { %v1402_v23 = vadd.f32 %v1401_v44, %v2945_v33  ;;  %v1403_v45 = vpop.f32.mrb[54].mxu0  ;;  %1674 = vmatprep.mubr.bf16.mxu1 %v1469_v32 }
 0x378   : > { %v1404_v46 = vadd.f32 %v1403_v45, %v2942_v30  ;;  %v1405_v25 = vpop.f32.mrb[55].mxu0  ;;  %1675 = vmatmul.mubr.bf16.gmra.mrb[40].mxu1 %v1468_v41  ;;  %v1448_v48 = vmax.f32 %v1400_v43, 0.0 }
 0x379   : > { %v1406_v47 = vadd.f32 %v1405_v25, %v2945_v33  ;;  %v1449_v50 = vmax.f32 %v1402_v23, 0.0 }
 0x37a   : > { %v1450_v49 = vmax.f32 %v1404_v46, 0.0 }
 0x37b   : > { %v1451_v51 = vmax.f32 %v1406_v47, 0.0 }
 0x37c   : > { %v1470_v52 = vpack.c.bf16 %v1450_v49, %v1448_v48 }
 0x37d   : > { %v1471_v53 = vpack.c.bf16 %v1451_v51, %v1449_v50  ;;  %v1409_v54 = vpop.f32.mrb[56].mxu0 }
 0x37e   : > { %v1410_v55 = vadd.f32 %v1409_v54, %v2942_v30  ;;  %v1411_v56 = vpop.f32.mrb[57].mxu0 }
 0x37f   : > { %v1412_v57 = vadd.f32 %v1411_v56, %v2945_v33  ;;  %v1413_v58 = vpop.f32.mrb[58].mxu0  ;;  %1682 = vmatprep.mubr.bf16.mxu1 %v1471_v53 }
 0x380   : > { %v1414_v59 = vadd.f32 %v1413_v58, %v2942_v30  ;;  %v1415_v60 = vpop.f32.mrb[59].mxu0  ;;  %1683 = vmatmul.mubr.bf16.gmra.mrb[44].mxu1 %v1470_v52  ;;  %v1452_v62 = vmax.f32 %v1410_v55, 0.0 }
 0x381   : > { %v1416_v61 = vadd.f32 %v1415_v60, %v2945_v33  ;;  %v1453_v0 = vmax.f32 %v1412_v57, 0.0 }
 0x382   : > { %v1454_v63 = vmax.f32 %v1414_v59, 0.0 }
 0x383   : > { %v1455_v1 = vmax.f32 %v1416_v61, 0.0 }
 0x384   : > { %v1472_v2 = vpack.c.bf16 %v1454_v63, %v1452_v62 }
 0x385   : > { %v1473_v3 = vpack.c.bf16 %v1455_v1, %v1453_v0  ;;  %v1419_v4 = vpop.f32.mrb[60].mxu0 }
 0x386   : > { %v1420_v5 = vadd.f32 %v1419_v4, %v2942_v30  ;;  %v1421_v6 = vpop.f32.mrb[61].mxu0 }
 0x387   : > { %v1422_v7 = vadd.f32 %v1421_v6, %v2945_v33  ;;  %v1423_v8 = vpop.f32.mrb[62].mxu0  ;;  %1690 = vmatprep.mubr.bf16.mxu1 %v1473_v3 }
 0x388   : > { %v1424_v9 = vadd.f32 %v1423_v8, %v2942_v30  ;;  %v1425_v10 = vpop.f32.mrb[63].mxu0  ;;  %1691 = vmatmul.mubr.bf16.gmra.mrb[48].mxu1 %v1472_v2  ;;  %v1456_v12 = vmax.f32 %v1420_v5, 0.0 }
 0x389   : > { %v1426_v11 = vadd.f32 %v1425_v10, %v2945_v33  ;;  %v1457_v14 = vmax.f32 %v1422_v7, 0.0 }
 0x38a   : > { %v1458_v13 = vmax.f32 %v1424_v9, 0.0 }
 0x38b   : > { %v1459_v15 = vmax.f32 %v1426_v11, 0.0 }
 0x38c   : > { %v1474_v16 = vpack.c.bf16 %v1458_v13, %v1456_v12 }
 0x38d   : > { %v1475_v17 = vpack.c.bf16 %v1459_v15, %v1457_v14 }
 0x38f   : > { %1698 = vmatprep.mubr.bf16.mxu1 %v1475_v17 }
 0x390   : > { %1699 = vmatmul.mubr.bf16.gmra.mrb[52].mxu1 %v1474_v16 }
 0x42b   : > { %v1993_v18 = vpop.f32.mrb[64].mxu0 }
 0x42c   : > { %v1994_v30 = vpop.f32.mrb[65].mxu0 }
 0x42d   : > { %v1995_v26 = vadd.f32 %v1994_v30, %v1993_v18  ;;  %v1996_v20 = vpop.f32.mrb[66].mxu0 }
 0x42e   : > { %v1997_v27 = vpop.f32.mrb[67].mxu0 }
 0x42f   : > { %v1645_v33 = vadd.f32 %v1995_v26, %v2983_v19  ;;  %v1998_v21 = vadd.f32 %v1997_v27, %v1996_v20 }
 0x431   : > { %1707 = vst [vmem:[%s2986_s16] sm:$0xff] %v1645_v33  ;;  %v1648_v22 = vadd.f32 %v1998_v21, %v2983_v19 }
 0x433   : > { %1708 = vst [vmem:[%s2986_s16 + $0x8] sm:$0xff] %v1648_v22  ;;  %v1999_v24 = vpop.f32.mrb[68].mxu0 }
 0x434   : > { %v2000_v28 = vpop.f32.mrb[69].mxu0 }
 0x435   : > { %v2001_v34 = vadd.f32 %v2000_v28, %v1999_v24  ;;  %v2002_v29 = vpop.f32.mrb[70].mxu0 }
 0x436   : > { %v2003_v35 = vpop.f32.mrb[71].mxu0 }
 0x437   : > { %v1653_v36 = vadd.f32 %v2001_v34, %v2983_v19  ;;  %v2004_v37 = vadd.f32 %v2003_v35, %v2002_v29 }
 0x439   : > { %1709 = vst [vmem:[%s2986_s16 + $0x10] sm:$0xff] %v1653_v36  ;;  %v1656_v38 = vadd.f32 %v2004_v37, %v2983_v19 }
 0x43b   : > { %1710 = vst [vmem:[%s2986_s16 + $0x18] sm:$0xff] %v1656_v38  ;;  %v2005_v39 = vpop.f32.mrb[32].mxu1 }
 0x43c   : > { %v2006_v40 = vpop.f32.mrb[33].mxu1 }
 0x43d   : > { %v2007_v31 = vadd.f32 %v2006_v40, %v2005_v39  ;;  %v2008_v41 = vpop.f32.mrb[34].mxu1 }
 0x43e   : > { %v2009_v32 = vpop.f32.mrb[35].mxu1 }
 0x43f   : > { %v1661_v42 = vadd.f32 %v2007_v31, %v2983_v19  ;;  %v2010_v43 = vadd.f32 %v2009_v32, %v2008_v41 }
 0x441   : > { %1711 = vst [vmem:[%s2986_s16 + $0x20] sm:$0xff] %v1661_v42  ;;  %v1664_v44 = vadd.f32 %v2010_v43, %v2983_v19 }
 0x443   : > { %1712 = vst [vmem:[%s2986_s16 + $0x28] sm:$0xff] %v1664_v44  ;;  %v2011_v23 = vpop.f32.mrb[36].mxu1 }
 0x444   : > { %v2012_v45 = vpop.f32.mrb[37].mxu1 }
 0x445   : > { %v2013_v46 = vadd.f32 %v2012_v45, %v2011_v23  ;;  %v2014_v25 = vpop.f32.mrb[38].mxu1 }
 0x446   : > { %v2015_v47 = vpop.f32.mrb[39].mxu1 }
 0x447   : > { %v1669_v48 = vadd.f32 %v2013_v46, %v2983_v19  ;;  %v2016_v49 = vadd.f32 %v2015_v47, %v2014_v25 }
 0x449   : > { %1713 = vst [vmem:[%s2986_s16 + $0x30] sm:$0xff] %v1669_v48  ;;  %v1672_v50 = vadd.f32 %v2016_v49, %v2983_v19 }
 0x44b   : > { %1714 = vst [vmem:[%s2986_s16 + $0x38] sm:$0xff] %v1672_v50  ;;  %v2017_v51 = vpop.f32.mrb[40].mxu1 }
 0x44c   : > { %v2018_v52 = vpop.f32.mrb[41].mxu1 }
 0x44d   : > { %v2019_v53 = vadd.f32 %v2018_v52, %v2017_v51  ;;  %v2020_v54 = vpop.f32.mrb[42].mxu1 }
 0x44e   : > { %v2021_v55 = vpop.f32.mrb[43].mxu1 }
 0x44f   : > { %v1677_v56 = vadd.f32 %v2019_v53, %v2983_v19  ;;  %v2022_v57 = vadd.f32 %v2021_v55, %v2020_v54 }
 0x451   : > { %1715 = vst [vmem:[%s2986_s16 + $0x40] sm:$0xff] %v1677_v56  ;;  %v1680_v58 = vadd.f32 %v2022_v57, %v2983_v19 }
 0x453   : > { %1716 = vst [vmem:[%s2986_s16 + $0x48] sm:$0xff] %v1680_v58  ;;  %v2023_v59 = vpop.f32.mrb[44].mxu1 }
 0x454   : > { %v2024_v60 = vpop.f32.mrb[45].mxu1 }
 0x455   : > { %v2025_v61 = vadd.f32 %v2024_v60, %v2023_v59  ;;  %v2026_v62 = vpop.f32.mrb[46].mxu1 }
 0x456   : > { %v2027_v63 = vpop.f32.mrb[47].mxu1 }
 0x457   : > { %v1685_v0 = vadd.f32 %v2025_v61, %v2983_v19  ;;  %v2028_v1 = vadd.f32 %v2027_v63, %v2026_v62 }
 0x459   : > { %1717 = vst [vmem:[%s2986_s16 + $0x50] sm:$0xff] %v1685_v0  ;;  %v1688_v2 = vadd.f32 %v2028_v1, %v2983_v19 }
 0x45b   : > { %1718 = vst [vmem:[%s2986_s16 + $0x58] sm:$0xff] %v1688_v2  ;;  %v2029_v3 = vpop.f32.mrb[48].mxu1 }
 0x45c   : > { %v2030_v4 = vpop.f32.mrb[49].mxu1 }
 0x45d   : > { %v2031_v5 = vadd.f32 %v2030_v4, %v2029_v3  ;;  %v2032_v6 = vpop.f32.mrb[50].mxu1 }
 0x45e   : > { %v2033_v7 = vpop.f32.mrb[51].mxu1 }
 0x45f   : > { %v1693_v8 = vadd.f32 %v2031_v5, %v2983_v19  ;;  %v2034_v9 = vadd.f32 %v2033_v7, %v2032_v6 }
 0x461   : > { %1719 = vst [vmem:[%s2986_s16 + $0x60] sm:$0xff] %v1693_v8  ;;  %v1696_v10 = vadd.f32 %v2034_v9, %v2983_v19 }
 0x463   : > { %1720 = vst [vmem:[%s2986_s16 + $0x68] sm:$0xff] %v1696_v10  ;;  %v2035_v11 = vpop.f32.mrb[52].mxu1 }
 0x464   : > { %v2036_v12 = vpop.f32.mrb[53].mxu1 }
 0x465   : > { %v2037_v13 = vadd.f32 %v2036_v12, %v2035_v11  ;;  %v2038_v14 = vpop.f32.mrb[54].mxu1 }
 0x466   : > { %v2039_v15 = vpop.f32.mrb[55].mxu1 }
 0x467   : > { %v1701_v16 = vadd.f32 %v2037_v13, %v2983_v19  ;;  %v2040_v17 = vadd.f32 %v2039_v15, %v2038_v14 }
 0x469   : > { %1721 = vst [vmem:[%s2986_s16 + $0x70] sm:$0xff] %v1701_v16  ;;  %v1704_v18 = vadd.f32 %v2040_v17, %v2983_v19 }
 0x46b   : > { %1722 = vst [vmem:[%s2986_s16 + $0x78] sm:$0xff] %v1704_v18 }
 0x46c   : > { %2450 = shalt.err (!%p2447_p13)
}
 0x46d   : > { %s2451_s22 = scalar_lea.hbm %s3021_s17, 2048  ;;  %s2455_s16 = scalar_lea.hbm %s3103_s15, 4096 }
 0x46e   : > { %p2452_p9 = scmp.ne.s32.totalorder %s3021_s17, %s2451_s22  ;;  %p2456_p4 = scmp.lt.u32.totalorder %s3021_s17, %s3103_s15 }
 0x46f   : > { %p2457_p8 = scmp.lt.u32.totalorder %s2455_s16, %s2451_s22  ;;  %p2459_p10 = scmp.lt.u32.totalorder %s2451_s22, %s3021_s17 }
 0x470   : > { %p2453_p0 = pnand %p2452_p9, %p2750_p3 }
 0x471   : > { %p2458_p6 = por %p2457_p8, %p2456_p4 }
 0x472   : > { %p2454_p11 = pneg %p2453_p0 }
 0x473   : > { %p2460_p5 = por %p2459_p10, %p2458_p6 }
 0x475   : > { %p2461_p7 = pnand %p2460_p5, %p2454_p11 }
 0x477   : > { %2464 = shalt.err (!%p2461_p7)
}
 0x478   : > { %s2524_s29 = smov 128   ;;  %s2525_s25 = smov 8  }
 0x479   : > { %2075 = dma.vmem_to_hbm [thread:$0]  (%p2750_p3), %s3023_s21, 2048, %s3021_s17, %s1724_s13, %s2524_s29, %s2524_s29, %s2525_s25  }
 0x47a PF: > { %s3104_s14 = sld [smem:[#allocation16_spill]]  ;;  %s3105_s19 = sld [smem:[#allocation17_spill]] }
 0x47b   : > { %p3107_p1 = scmp.ge.s32.totalorder %s2511_s12, 2 }
 0x480   : > { %s1752_s26 = sand.u32 1, %s3104_s14   ;;  %p3106_p12 = scmp.ne.s32.totalorder %s3105_s19, 0 }
 0x481   : > { %s1753_s22 = scalar_lea.sflag [#allocation4], %s1752_s26 }
 0x482   : > { %p2095_p2 = pnand %p3107_p1, %p3106_p12 }
 0x484   : > { %2494 = dma.done.wait (!%p2095_p2), %s1753_s22, 2048  }
 0x485   : > { %2496 = vsyncadd (!%p2095_p2), %s1753_s22, 4294965248  ;;  %p24_p13 = scmp.ge.s32.totalorder %s2737_s9, 4   ;;  %s3108_s30 = smov %s2503_s10 }
 0x486   : > { %s3109_s10 = smov %s2507_s11  ;;  %s3110_s11 = smov %s2746_s28 }
 0x487   : > { %s3111_s12 = smov %s2737_s9  ;;  %26 = sbr.rel (!%p24_p13) target bundleno = 9 (0x9), region = 117 }
 0x48e   :  { %1758 = vsyncpa [#allocation3], 1 }
 0x48f   :  { %1760 = vsyncpa [#allocation3 + $0x1], 1 }
 0x490   :  { %1761 = vsyncpa [#allocation6], 1 }
 0x491   :  { %1762 = vsyncpa [#allocation9], 1 }
 0x492   :  { %1763 = vsyncpa [#allocation4], 1 }
 0x493   :  { %1765 = vsyncpa [#allocation4 + $0x1], 1 }

</bundles_post_ra>
